<compile_context>
chip_gen: v7x
topology: tpu7x:2x2x1
jax: 0.10.0
libtpu: 0.0.40
codegen_flags: <defaults>
</compile_context>

<pallas_src>
import jax
import jax.numpy as jnp
import numpy as np
from jax.experimental import pallas as pl
from jax.experimental.pallas import tpu as pltpu

BF16 = jnp.bfloat16
F32 = jnp.float32
LN_EPS = 1e-5
NORM_EPS = 1e-12


# ----------------------------------------------------------------------------
# Small helpers
# ----------------------------------------------------------------------------
def _round_up(x, m):
    return ((x + m - 1) // m) * m


def _vmem_limit_bytes():
    cap = 128 * 1024 * 1024
    try:
        info = pltpu.get_tpu_info()
        cap = int(getattr(info, "vmem_capacity_bytes", cap)) or cap
    except Exception:
        pass
    # ~48 MiB on v7x (64 MiB VMEM), ~96 MiB on v5e/v6e (128 MiB VMEM).
    return min(96 * 1024 * 1024, (cap * 3) // 4)


def _spec(shape, index_map, buffers=None):
    """BlockSpec with optional pipeline buffer-count; falls back if the running
    jax does not accept pipeline_mode on BlockSpec."""
    if buffers is not None and hasattr(pl, "Buffered"):
        try:
            return pl.BlockSpec(shape, index_map,
                                pipeline_mode=pl.Buffered(buffers))
        except (TypeError, ValueError):
            pass
    return pl.BlockSpec(shape, index_map)


def _choose_text_groups(n_cls, seq_len, width, vmem_limit):
    """Smallest #groups (>=2 when possible, for megacore + pipeline overlap)
    whose per-step f32 intermediates fit a fraction of the VMEM budget."""
    budget = vmem_limit // 4
    divisors = [d for d in range(1, n_cls + 1) if n_cls % d == 0]
    for ng in divisors:
        if ng == 1 and n_cls > 1:
            continue
        cg = n_cls // ng
        # x/residuals + qkv + mlp hidden (~11*width per token) + scores/attn.
        live = 4 * cg * seq_len * (11 * width + 2 * seq_len)
        if live <= budget:
            return ng
    return n_cls


def _choose_image_tiling(k_feat, e, batch, n_seg, vmem_limit):
    """Largest K tile (multiple of 128, <=2048) whose buffered tiles fit the
    VMEM budget; k_feat is zero-padded to a multiple of the tile."""
    budget = vmem_limit // 2
    tk = 2048
    while tk > 128:
        need = 3 * tk * e * 2 + 2 * batch * n_seg * tk * 4
        if need <= budget:
            break
        tk //= 2
    tk = min(tk, _round_up(k_feat, 128))
    k_pad = _round_up(k_feat, tk)
    return tk, k_pad


def _layernorm(x, g, b, eps=LN_EPS):
    mu = jnp.mean(x, axis=-1, keepdims=True)
    xc = x - mu
    var = jnp.mean(xc * xc, axis=-1, keepdims=True)
    return xc * jax.lax.rsqrt(var + eps) * g + b


# ----------------------------------------------------------------------------
# Kernel 1: fused  segment-mean-pool + image projection + L2-norm + logits
#           grid = (batch tiles [parallel], K tiles [reduction, last])
# ----------------------------------------------------------------------------
def _image_logits_kernel(x_ref, w_ref, b_ref, txt_ref, ls_ref, o_ref, acc_ref):
    k = pl.program_id(1)

    @pl.when(k == 0)
    def _():
        acc_ref[...] = jnp.zeros_like(acc_ref)

    # fusion_model (mean over n_seg) commutes with the affine projection, so
    # pool the raw per-frame features of this K-chunk before the matmul.
    xm = jnp.mean(x_ref[...], axis=1)                          # (tb, tk) f32
    acc_ref[...] += jnp.dot(xm.astype(BF16), w_ref[...],
                            preferred_element_type=F32)

    @pl.when(k == pl.num_programs(1) - 1)
    def _():
        img = acc_ref[...] + b_ref[...]                        # (tb, E) f32
        img = img * jax.lax.rsqrt(
            jnp.sum(img * img, axis=-1, keepdims=True) + NORM_EPS)
        # txt_ref is (n_pad, E) bf16, pre-normalized: contract on E, no .T.
        logits = jax.lax.dot_general(
            img.astype(BF16), txt_ref[...],
            dimension_numbers=(((1,), (1,)), ((), ())),
            preferred_element_type=F32)                        # (tb, n_pad)
        o_ref[...] = ls_ref[0, 0] * logits                     # ls from SMEM


def image_logits(x_bsk, w_pad_bf16, b_img, txt_pad_bf16, ls_scalar,
                 *, tk, vmem_limit):
    b, n_seg, k_pad = x_bsk.shape
    e = w_pad_bf16.shape[1]
    n_pad = txt_pad_bf16.shape[0]
    nk = k_pad // tk

    # Batch-parallel axis (feeds both v7x TensorCores) only when B is large —
    # splitting a tiny batch would just re-stream w_img.
    tb = b // 2 if (b >= 16 and b % 2 == 0) else b
    nb = b // tb

    grid_spec = pltpu.PrefetchScalarGridSpec(
        num_scalar_prefetch=0,
        grid=(nb, nk),
        in_specs=[
            pl.BlockSpec((tb, n_seg, tk), lambda bi, ki: (bi, 0, ki)),
            _spec((tk, e), lambda bi, ki: (ki, 0), buffers=3),   # streamed w
            _spec((1, e), lambda bi, ki: (0, 0), buffers=1),     # invariant
            _spec((n_pad, e), lambda bi, ki: (0, 0), buffers=1), # invariant
            pl.BlockSpec((1, 1), lambda bi, ki: (0, 0),
                         memory_space=pltpu.MemorySpace.SMEM),   # logit scale
        ],
        out_specs=pl.BlockSpec((tb, n_pad), lambda bi, ki: (bi, 0)),
        scratch_shapes=[pltpu.VMEM((tb, e), F32)],
    )
    return pl.pallas_call(
        _image_logits_kernel,
        out_shape=jax.ShapeDtypeStruct((b, n_pad), F32),
        grid_spec=grid_spec,
        compiler_params=pltpu.CompilerParams(
            dimension_semantics=("parallel", "arbitrary"),
            vmem_limit_bytes=vmem_limit),
    )(x_bsk, w_pad_bf16, b_img, txt_pad_bf16, ls_scalar)


# ----------------------------------------------------------------------------
# Kernel 2: text encoder — cg classes per grid step, fused QKV,
#           one-hot-matmul EOT gather, bf16 normalized output
# ----------------------------------------------------------------------------
def _text_encoder_kernel(
    prompts_ref, eot_ref, pos_ref,
    g1_ref, b1_ref,
    wqkv_ref, bqkv_ref, wo_ref, bo_ref,
    g2_ref, b2_ref,
    wfc1_ref, bfc1_ref, wfc2_ref, bfc2_ref,
    gf_ref, bf_ref,
    tproj_ref,
    out_ref,
):
    cg, seq_len, width = prompts_ref.shape

    x = prompts_ref[...] + pos_ref[...][None]                  # (CG, L, D) f32
    x2 = x.reshape(cg * seq_len, width)                        # (CG*L, D)

    # --- residual attention block (pre-LN, causal, single head), fused QKV ---
    h = _layernorm(x2, g1_ref[...], b1_ref[...])
    qkv = jnp.dot(h.astype(BF16), wqkv_ref[...],
                  preferred_element_type=F32) + bqkv_ref[...]  # (CG*L, 3D)
    q = qkv[:, :width].reshape(cg, seq_len, width)
    k = qkv[:, width:2 * width].reshape(cg, seq_len, width)
    v = qkv[:, 2 * width:].reshape(cg, seq_len, width)

    scale = 1.0 / float(width) ** 0.5
    scores = jax.lax.dot_general(                              # q @ k^T, no .T
        q.astype(BF16), k.astype(BF16),
        dimension_numbers=(((2,), (2,)), ((0,), (0,))),
        preferred_element_type=F32) * scale                    # (CG, L, L)
    row = jax.lax.broadcasted_iota(jnp.int32, (seq_len, seq_len), 0)
    col = jax.lax.broadcasted_iota(jnp.int32, (seq_len, seq_len), 1)
    scores = jnp.where((col <= row)[None], scores, -1e30)      # causal mask
    scores = scores - jnp.max(scores, axis=-1, keepdims=True)
    p = jnp.exp(scores)
    # softmax divide on the EUP slot (approx reciprocal): frees VALU slots.
    attn = p * pl.reciprocal(jnp.sum(p, axis=-1, keepdims=True), approx=True)
    ctx = jax.lax.dot_general(
        attn.astype(BF16), v.astype(BF16),
        dimension_numbers=(((2,), (1,)), ((0,), (0,))),
        preferred_element_type=F32)                            # (CG, L, D)
    x2 = x2 + jnp.dot(ctx.reshape(cg * seq_len, width).astype(BF16), wo_ref[...],
                      preferred_element_type=F32) + bo_ref[...]

    # --- residual MLP block (pre-LN, QuickGELU) ---
    h2 = _layernorm(x2, g2_ref[...], b2_ref[...])
    u = jnp.dot(h2.astype(BF16), wfc1_ref[...],
                preferred_element_type=F32) + bfc1_ref[...]
    u = u * jax.nn.sigmoid(1.702 * u)
    x2 = x2 + jnp.dot(u.astype(BF16), wfc2_ref[...],
                      preferred_element_type=F32) + bfc2_ref[...]

    # --- EOT gather via one-hot matmul (no scratch, no per-class unroll) ---
    eot = eot_ref[0]                                           # (CG, 1) int32
    flat_pos = jax.lax.broadcasted_iota(jnp.int32, (cg, cg * seq_len), 1)
    row_id = jax.lax.broadcasted_iota(jnp.int32, (cg, cg * seq_len), 0)
    onehot = (flat_pos == row_id * seq_len + eot).astype(F32)  # (CG, CG*L)
    feat = jnp.dot(onehot, x2, preferred_element_type=F32)     # exact f32 gather

    # --- ln_final on gathered rows, project, L2-normalize, emit bf16 ---
    feat = _layernorm(feat, gf_ref[...], bf_ref[...])
    txt = jnp.dot(feat.astype(BF16), tproj_ref[...],
                  preferred_element_type=F32)                  # (CG, E)
    txt = txt * jax.lax.rsqrt(jnp.sum(txt * txt, -1, keepdims=True) + NORM_EPS)
    out_ref[0] = txt.astype(out_ref.dtype)


def text_encoder(prep):
    prompts = prep["prompts"]
    n_cls, seq_len, width = prompts.shape
    embed_dim = prep["text_proj"].shape[1]
    n_groups = prep["n_groups"]
    cg = n_cls // n_groups

    weights = [
        prep["pos_emb"],
        prep["ln1_g"], prep["ln1_b"],
        prep["wqkv"], prep["bqkv"],
        prep["wo"], prep["bo"],
        prep["ln2_g"], prep["ln2_b"],
        prep["wfc1"], prep["bfc1"], prep["wfc2"], prep["bfc2"],
        prep["lnf_g"], prep["lnf_b"],
        prep["text_proj"],
    ]

    def invariant(arr):
        nd = arr.ndim
        return _spec(arr.shape, lambda *_: (0,) * nd, buffers=1)

    grid_spec = pltpu.PrefetchScalarGridSpec(
        num_scalar_prefetch=0,
        grid=(n_groups,),
        in_specs=[pl.BlockSpec((cg, seq_len, width), lambda g: (g, 0, 0)),
                  pl.BlockSpec((1, cg, 1), lambda g: (g, 0, 0))]
        + [invariant(w) for w in weights],
        out_specs=pl.BlockSpec((1, cg, embed_dim), lambda g: (g, 0, 0)),
    )

    out = pl.pallas_call(
        _text_encoder_kernel,
        out_shape=jax.ShapeDtypeStruct((n_groups, cg, embed_dim), BF16),
        grid_spec=grid_spec,
        compiler_params=pltpu.CompilerParams(
            dimension_semantics=("parallel",),   # groups -> both TCs on v7x
            vmem_limit_bytes=prep["vmem_limit"]),
    )(prompts, prep["eot"], *weights)
    return out.reshape(n_cls, embed_dim)         # L2-normalized bf16 features


# ----------------------------------------------------------------------------
# CoopCLIP glue (prompt assembly + cached constants + forward_test)
# ----------------------------------------------------------------------------
def prompt_learner_forward(p, n_cls):
    ctx = p["ctx"]                                             # (n_ctx, D) generic
    ctx = jnp.broadcast_to(ctx[None], (n_cls,) + ctx.shape)
    # class_token_position == 'end'
    # TODO(synk): 'middle'/'front' prompt layouts not implemented.
    return jnp.concatenate([p["token_prefix"], ctx, p["token_suffix"]], axis=1)


def prepare_inference(p, *, n_seg, batch_hint=8):
    """One-time caching of constants: prompt assembly, fused/cast weights,
    padded w_img, tiling choices and VMEM limits."""
    vmem_limit = _vmem_limit_bytes()
    n_cls = p["token_prefix"].shape[0]
    prompts = prompt_learner_forward(p, n_cls)                 # (n_cls, L, D)
    seq_len, width = prompts.shape[1], prompts.shape[2]
    embed_dim = p["text_proj"].shape[1]
    k_feat = p["w_img"].shape[0]

    n_groups = _choose_text_groups(n_cls, seq_len, width, vmem_limit)
    cg = n_cls // n_groups
    tk, k_pad = _choose_image_tiling(k_feat, embed_dim, batch_hint, n_seg,
                                     vmem_limit)
    n_pad = max(128, _round_up(n_cls, 128))

    wqkv = jnp.concatenate([p["wq"], p["wk"], p["wv"]], axis=1).astype(BF16)
    bqkv = jnp.concatenate([p["bq"], p["bk"], p["bv"]], axis=1)
    w_img_pad = jnp.pad(p["w_img"], ((0, k_pad - k_feat), (0, 0))).astype(BF16)

    return {
        "vmem_limit": vmem_limit, "n_groups": n_groups,
        "tk": tk, "k_pad": k_pad, "n_pad": n_pad, "n_cls": n_cls,
        "prompts": prompts,
        "eot": p["eot_idx"].reshape(n_groups, cg, 1).astype(jnp.int32),
        "pos_emb": p["pos_emb"],
        "ln1_g": p["ln1_g"], "ln1_b": p["ln1_b"],
        "wqkv": wqkv, "bqkv": bqkv,
        "wo": p["wo"].astype(BF16), "bo": p["bo"],
        "ln2_g": p["ln2_g"], "ln2_b": p["ln2_b"],
        "wfc1": p["wfc1"].astype(BF16), "bfc1": p["bfc1"],
        "wfc2": p["wfc2"].astype(BF16), "bfc2": p["bfc2"],
        "lnf_g": p["lnf_g"], "lnf_b": p["lnf_b"],
        "text_proj": p["text_proj"].astype(BF16),
        "w_img_pad": w_img_pad, "b_img": p["b_img"],
        "ls": p["logit_scale_exp"].reshape(1, 1).astype(F32),
    }


def coop_clip_forward_test(prep, image, class_id, n_seg):
    del class_id  # unused in forward_test
    bt = image.shape[0]
    b = bt // n_seg
    k_feat = int(np.prod(image.shape[1:]))
    x = image.reshape(b, n_seg, k_feat).astype(F32)            # NCHW -> (B,T,K)
    if k_feat < prep["k_pad"]:                                 # zero-pad K (exact)
        x = jnp.pad(x, ((0, 0), (0, 0), (0, prep["k_pad"] - k_feat)))

    txt = text_encoder(prep)                                   # (n_cls, E) bf16, normalized
    n_cls = prep["n_cls"]
    # lane-dense logits: zero-pad the class axis (rows) to n_pad; the image
    # kernel contracts on E, so no transpose / cast between the two kernels.
    txt_pad = jnp.pad(txt, ((0, prep["n_pad"] - n_cls), (0, 0)))

    logits_pad = image_logits(x, prep["w_img_pad"], prep["b_img"], txt_pad,
                              prep["ls"], tk=prep["tk"],
                              vmem_limit=prep["vmem_limit"])
    return logits_pad[:, :n_cls]


# ----------------------------------------------------------------------------
# Pure-JAX reference (mirrors the kernels' bf16-matmul / f32-statistics math,
# exact softmax division and exact EOT gather)
# ----------------------------------------------------------------------------
def _mm(a, b):
    return jnp.dot(a.astype(BF16), b.astype(BF16), preferred_element_type=F32)


def coop_clip_reference(p, image, n_seg):
    bt = image.shape[0]
    b = bt // n_seg
    xm = image.reshape(b, n_seg, -1).astype(F32).mean(axis=1)
    img = _mm(xm, p["w_img"]) + p["b_img"]
    img = img * jax.lax.rsqrt(jnp.sum(img * img, -1, keepdims=True) + NORM_EPS)

    n_cls, width = p["token_prefix"].shape[0], p["ctx"].shape[-1]
    prompts = prompt_learner_forward(p, n_cls)
    x = prompts + p["pos_emb"]
    h = _layernorm(x, p["ln1_g"], p["ln1_b"])
    q = _mm(h, p["wq"]) + p["bq"]
    k = _mm(h, p["wk"]) + p["bk"]
    v = _mm(h, p["wv"]) + p["bv"]
    scale = 1.0 / float(width) ** 0.5
    scores = jnp.einsum("cld,cmd->clm", q.astype(BF16), k.astype(BF16),
                        preferred_element_type=F32) * scale
    L = x.shape[1]
    mask = jnp.tril(jnp.ones((L, L), bool))
    scores = jnp.where(mask[None], scores, -1e30)
    scores = scores - jnp.max(scores, axis=-1, keepdims=True)
    pr = jnp.exp(scores)
    attn = pr / jnp.sum(pr, axis=-1, keepdims=True)
    ctx = jnp.einsum("clm,cmd->cld", attn.astype(BF16), v.astype(BF16),
                     preferred_element_type=F32)
    x = x + _mm(ctx, p["wo"]) + p["bo"]
    h2 = _layernorm(x, p["ln2_g"], p["ln2_b"])
    u = _mm(h2, p["wfc1"]) + p["bfc1"]
    u = u * jax.nn.sigmoid(1.702 * u)
    x = x + _mm(u, p["wfc2"]) + p["bfc2"]
    x = _layernorm(x, p["lnf_g"], p["lnf_b"])
    txt = _mm(x[jnp.arange(n_cls), p["eot_idx"]], p["text_proj"])
    txt = txt * jax.lax.rsqrt(jnp.sum(txt * txt, -1, keepdims=True) + NORM_EPS)
    return p["logit_scale_exp"][0] * _mm(img, txt.T)


# ----------------------------------------------------------------------------
# Deterministic parameter construction
# ----------------------------------------------------------------------------
def build_params(key, *, n_cls, n_ctx, seq_len, width, embed_dim, img_feat, name_lens):
    ks = iter(jax.random.split(key, 32))

    def nrm(shape, std=0.02):
        return std * jax.random.normal(next(ks), shape, F32)

    vocab, sot_id, eot_id, ctx_id = 64, 62, 63, 1
    tok = np.zeros((n_cls, seq_len), np.int32)
    for i, nl in enumerate(name_lens):
        toks = [sot_id] + [ctx_id] * n_ctx + list(range(2, 2 + nl)) + [eot_id]
        tok[i, : len(toks)] = toks
    tokenized = jnp.asarray(tok)
    emb_table = nrm((vocab, width))
    embedding = emb_table[tokenized]                           # (n_cls, L, D)

    hidden = 4 * width
    return {
        "ctx": nrm((n_ctx, width)),                            # PromptLearner.ctx
        "token_prefix": embedding[:, :1, :],
        "token_suffix": embedding[:, 1 + n_ctx:, :],
        "eot_idx": jnp.argmax(tokenized, axis=-1).astype(jnp.int32),
        "pos_emb": nrm((seq_len, width), 0.01),
        "ln1_g": jnp.ones((1, width), F32), "ln1_b": jnp.zeros((1, width), F32),
        "wq": nrm((width, width)), "bq": jnp.zeros((1, width), F32),
        "wk": nrm((width, width)), "bk": jnp.zeros((1, width), F32),
        "wv": nrm((width, width)), "bv": jnp.zeros((1, width), F32),
        "wo": nrm((width, width)), "bo": jnp.zeros((1, width), F32),
        "ln2_g": jnp.ones((1, width), F32), "ln2_b": jnp.zeros((1, width), F32),
        "wfc1": nrm((width, hidden)), "bfc1": jnp.zeros((1, hidden), F32),
        "wfc2": nrm((hidden, width)), "bfc2": jnp.zeros((1, width), F32),
        "lnf_g": jnp.ones((1, width), F32), "lnf_b": jnp.zeros((1, width), F32),
        "text_proj": nrm((width, embed_dim)),
        "w_img": nrm((img_feat, embed_dim)),
        "b_img": nrm((1, embed_dim), 0.01),
        "logit_scale_exp": jnp.exp(jnp.full((1,), np.log(1.0 / 0.07), F32)),
    }


if __name__ == "__main__":
    # Small shapes consistent with the module's forward; feature dims are
    # multiples of 128 for lane-dense vregs / full MXU columns.
    B, n_seg, C, H, W = 2, 4, 3, 16, 16
    n_cls, n_ctx, seq_len = 4, 4, 16
    width, embed_dim = 128, 128
    name_lens = [1, 2, 3, 1]

    key = jax.random.PRNGKey(0)
    kp, kx = jax.random.split(key)
    params = build_params(
        kp, n_cls=n_cls, n_ctx=n_ctx, seq_len=seq_len, width=width,
        embed_dim=embed_dim, img_feat=C * H * W, name_lens=name_lens,
    )
    prep = prepare_inference(params, n_seg=n_seg, batch_hint=B)  # cached constants

    image = jax.random.normal(kx, (B * n_seg, C, H, W), F32)   # NCHW
    class_id = jnp.arange(B, dtype=jnp.int32) % n_cls          # unused (test path)

    logits = jax.block_until_ready(
        coop_clip_forward_test(prep, image, class_id, n_seg)
    )
    ref = jax.block_until_ready(coop_clip_reference(params, image, n_seg))

    assert logits.shape == (B, n_cls), logits.shape
    np.testing.assert_allclose(np.asarray(logits), np.asarray(ref),
                               rtol=2e-2, atol=2e-2)
    print("KERNEL_OK")
</pallas_src>

<mosaic_0001>
module attributes {stable_mosaic.version = 11 : i64} {
  func.func @_text_encoder_kernel(%arg0: i32, %arg1: memref<2x16x128xf32, #tpu.memory_space<vmem>>, %arg2: memref<1x2x1xi32, #tpu.memory_space<vmem>>, %arg3: memref<16x128xf32, #tpu.memory_space<vmem>>, %arg4: memref<1x128xf32, #tpu.memory_space<vmem>>, %arg5: memref<1x128xf32, #tpu.memory_space<vmem>>, %arg6: memref<128x384xbf16, #tpu.memory_space<vmem>>, %arg7: memref<1x384xf32, #tpu.memory_space<vmem>>, %arg8: memref<128x128xbf16, #tpu.memory_space<vmem>>, %arg9: memref<1x128xf32, #tpu.memory_space<vmem>>, %arg10: memref<1x128xf32, #tpu.memory_space<vmem>>, %arg11: memref<1x128xf32, #tpu.memory_space<vmem>>, %arg12: memref<128x512xbf16, #tpu.memory_space<vmem>>, %arg13: memref<1x512xf32, #tpu.memory_space<vmem>>, %arg14: memref<512x128xbf16, #tpu.memory_space<vmem>>, %arg15: memref<1x128xf32, #tpu.memory_space<vmem>>, %arg16: memref<1x128xf32, #tpu.memory_space<vmem>>, %arg17: memref<1x128xf32, #tpu.memory_space<vmem>>, %arg18: memref<128x128xbf16, #tpu.memory_space<vmem>>, %arg19: memref<1x2x128xbf16, #tpu.memory_space<vmem>>) attributes {dimension_semantics = [#tpu.dimension_semantics<parallel>], iteration_bounds = array<i64: 2>, scalar_prefetch = 0 : i64, scratch_operands = 0 : i64, tpu.core_type = #tpu.core_type<tc>, window_params = [{transform_indices = @transform_0, window_bounds = array<i64: 2, 16, 128>}, {transform_indices = @transform_1, window_bounds = array<i64: 1, 2, 1>}, {pipeline_mode = #tpu.pipeline_mode<synchronous>, transform_indices = @transform_2, window_bounds = array<i64: 16, 128>}, {pipeline_mode = #tpu.pipeline_mode<synchronous>, transform_indices = @transform_3, window_bounds = array<i64: 1, 128>}, {pipeline_mode = #tpu.pipeline_mode<synchronous>, transform_indices = @transform_4, window_bounds = array<i64: 1, 128>}, {pipeline_mode = #tpu.pipeline_mode<synchronous>, transform_indices = @transform_5, window_bounds = array<i64: 128, 384>}, {pipeline_mode = #tpu.pipeline_mode<synchronous>, transform_indices = @transform_6, window_bounds = array<i64: 1, 384>}, {pipeline_mode = #tpu.pipeline_mode<synchronous>, transform_indices = @transform_7, window_bounds = array<i64: 128, 128>}, {pipeline_mode = #tpu.pipeline_mode<synchronous>, transform_indices = @transform_8, window_bounds = array<i64: 1, 128>}, {pipeline_mode = #tpu.pipeline_mode<synchronous>, transform_indices = @transform_9, window_bounds = array<i64: 1, 128>}, {pipeline_mode = #tpu.pipeline_mode<synchronous>, transform_indices = @transform_10, window_bounds = array<i64: 1, 128>}, {pipeline_mode = #tpu.pipeline_mode<synchronous>, transform_indices = @transform_11, window_bounds = array<i64: 128, 512>}, {pipeline_mode = #tpu.pipeline_mode<synchronous>, transform_indices = @transform_12, window_bounds = array<i64: 1, 512>}, {pipeline_mode = #tpu.pipeline_mode<synchronous>, transform_indices = @transform_13, window_bounds = array<i64: 512, 128>}, {pipeline_mode = #tpu.pipeline_mode<synchronous>, transform_indices = @transform_14, window_bounds = array<i64: 1, 128>}, {pipeline_mode = #tpu.pipeline_mode<synchronous>, transform_indices = @transform_15, window_bounds = array<i64: 1, 128>}, {pipeline_mode = #tpu.pipeline_mode<synchronous>, transform_indices = @transform_16, window_bounds = array<i64: 1, 128>}, {pipeline_mode = #tpu.pipeline_mode<synchronous>, transform_indices = @transform_17, window_bounds = array<i64: 128, 128>}, {transform_indices = @transform_18, window_bounds = array<i64: 1, 2, 128>}]} {
    %c0 = arith.constant 0 : index
    %c0_0 = arith.constant 0 : index
    %c0_1 = arith.constant 0 : index
    %0 = vector.load %arg1[%c0, %c0_0, %c0_1] : memref<2x16x128xf32, #tpu.memory_space<vmem>>, vector<2x16x128xf32>
    %c0_2 = arith.constant 0 : index
    %c0_3 = arith.constant 0 : index
    %1 = vector.load %arg3[%c0_2, %c0_3] : memref<16x128xf32, #tpu.memory_space<vmem>>, vector<16x128xf32>
    %2 = vector.shape_cast %1 : vector<16x128xf32> to vector<1x16x128xf32>
    %3 = vector.broadcast %2 : vector<1x16x128xf32> to vector<2x16x128xf32>
    %4 = arith.addf %0, %3 : vector<2x16x128xf32>
    %5 = vector.shape_cast %4 : vector<2x16x128xf32> to vector<32x128xf32>
    %c0_4 = arith.constant 0 : index
    %c0_5 = arith.constant 0 : index
    %6 = vector.load %arg4[%c0_4, %c0_5] : memref<1x128xf32, #tpu.memory_space<vmem>>, vector<1x128xf32>
    %c0_6 = arith.constant 0 : index
    %c0_7 = arith.constant 0 : index
    %7 = vector.load %arg5[%c0_6, %c0_7] : memref<1x128xf32, #tpu.memory_space<vmem>>, vector<1x128xf32>
    %cst = arith.constant dense<0.000000e+00> : vector<32xf32>
    %8 = vector.multi_reduction <add>, %5, %cst [1] : vector<32x128xf32> to vector<32xf32>
    %9 = vector.shape_cast %8 : vector<32xf32> to vector<32x1xf32>
    %cst_8 = arith.constant 1.280000e+02 : f32
    %10 = vector.broadcast %cst_8 : f32 to vector<32x1xf32>
    %11 = arith.divf %9, %10 : vector<32x1xf32>
    %12 = vector.broadcast %11 : vector<32x1xf32> to vector<32x128xf32>
    %13 = arith.subf %5, %12 : vector<32x128xf32>
    %14 = arith.mulf %13, %13 : vector<32x128xf32>
    %cst_9 = arith.constant dense<0.000000e+00> : vector<32xf32>
    %15 = vector.multi_reduction <add>, %14, %cst_9 [1] : vector<32x128xf32> to vector<32xf32>
    %16 = vector.shape_cast %15 : vector<32xf32> to vector<32x1xf32>
    %cst_10 = arith.constant 1.280000e+02 : f32
    %17 = vector.broadcast %cst_10 : f32 to vector<32x1xf32>
    %18 = arith.divf %16, %17 : vector<32x1xf32>
    %cst_11 = arith.constant 9.99999974E-6 : f32
    %19 = vector.broadcast %cst_11 : f32 to vector<32x1xf32>
    %20 = arith.addf %18, %19 : vector<32x1xf32>
    %21 = math.rsqrt %20 : vector<32x1xf32>
    %22 = vector.broadcast %21 : vector<32x1xf32> to vector<32x128xf32>
    %23 = arith.mulf %13, %22 : vector<32x128xf32>
    %24 = vector.broadcast %6 : vector<1x128xf32> to vector<32x128xf32>
    %25 = arith.mulf %23, %24 : vector<32x128xf32>
    %26 = vector.broadcast %7 : vector<1x128xf32> to vector<32x128xf32>
    %27 = arith.addf %25, %26 : vector<32x128xf32>
    %28 = arith.truncf %27 : vector<32x128xf32> to vector<32x128xbf16>
    %c0_12 = arith.constant 0 : index
    %c0_13 = arith.constant 0 : index
    %29 = vector.load %arg6[%c0_12, %c0_13] : memref<128x384xbf16, #tpu.memory_space<vmem>>, vector<128x384xbf16>
    %cst_14 = arith.constant dense<0.000000e+00> : vector<32x384xf32>
    %30 = tpu.matmul %28, %29, %cst_14 {dimension_numbers = #tpu.dot_dimension_numbers<[1], [0], [0], [1], [0, 0, 1, 1], [], []>} : vector<32x128xbf16>, vector<128x384xbf16>, vector<32x384xf32> -> vector<32x384xf32>
    %c0_15 = arith.constant 0 : index
    %c0_16 = arith.constant 0 : index
    %31 = vector.load %arg7[%c0_15, %c0_16] : memref<1x384xf32, #tpu.memory_space<vmem>>, vector<1x384xf32>
    %32 = vector.broadcast %31 : vector<1x384xf32> to vector<32x384xf32>
    %33 = arith.addf %30, %32 : vector<32x384xf32>
    %34 = vector.extract_strided_slice %33 {offsets = [0, 0], sizes = [32, 128], strides = [1, 1]} : vector<32x384xf32> to vector<32x128xf32>
    %35 = vector.shape_cast %34 : vector<32x128xf32> to vector<2x16x128xf32>
    %36 = vector.extract_strided_slice %33 {offsets = [0, 128], sizes = [32, 128], strides = [1, 1]} : vector<32x384xf32> to vector<32x128xf32>
    %37 = vector.shape_cast %36 : vector<32x128xf32> to vector<2x16x128xf32>
    %38 = vector.extract_strided_slice %33 {offsets = [0, 256], sizes = [32, 128], strides = [1, 1]} : vector<32x384xf32> to vector<32x128xf32>
    %39 = vector.shape_cast %38 : vector<32x128xf32> to vector<2x16x128xf32>
    %40 = arith.truncf %35 : vector<2x16x128xf32> to vector<2x16x128xbf16>
    %41 = arith.truncf %37 : vector<2x16x128xf32> to vector<2x16x128xbf16>
    %cst_17 = arith.constant dense<0.000000e+00> : vector<2x16x16xf32>
    %42 = tpu.matmul %40, %41, %cst_17 {dimension_numbers = #tpu.dot_dimension_numbers<[2], [2], [1], [1], [0, 0, 0, 1, 1, 1], [0], [0]>} : vector<2x16x128xbf16>, vector<2x16x128xbf16>, vector<2x16x16xf32> -> vector<2x16x16xf32>
    %cst_18 = arith.constant 0.0883883461 : f32
    %43 = vector.broadcast %cst_18 : f32 to vector<2x16x16xf32>
    %44 = arith.mulf %42, %43 : vector<2x16x16xf32>
    %45 = tpu.iota {dimensions = array<i32: 0>} : vector<16x16xi32>
    %46 = tpu.iota {dimensions = array<i32: 1>} : vector<16x16xi32>
    %47 = arith.cmpi sle, %46, %45 : vector<16x16xi32>
    %48 = vector.shape_cast %47 : vector<16x16xi1> to vector<1x16x16xi1>
    %cst_19 = arith.constant -1.000000e+30 : f32
    %49 = vector.shape_cast %48 : vector<1x16x16xi1> to vector<1x16x16xi1>
    %50 = vector.broadcast %49 : vector<1x16x16xi1> to vector<2x16x16xi1>
    %51 = vector.broadcast %cst_19 : f32 to vector<2x16x16xf32>
    %52 = arith.select %50, %44, %51 : vector<2x16x16xi1>, vector<2x16x16xf32>
    %cst_20 = arith.constant dense<0xFF800000> : vector<2x16xf32>
    %53 = vector.multi_reduction <maximumf>, %52, %cst_20 [2] : vector<2x16x16xf32> to vector<2x16xf32>
    %54 = vector.shape_cast %53 : vector<2x16xf32> to vector<2x16x1xf32>
    %55 = vector.broadcast %54 : vector<2x16x1xf32> to vector<2x16x16xf32>
    %56 = arith.subf %52, %55 : vector<2x16x16xf32>
    %57 = math.exp %56 : vector<2x16x16xf32>
    %cst_21 = arith.constant dense<0.000000e+00> : vector<2x16xf32>
    %58 = vector.multi_reduction <add>, %57, %cst_21 [2] : vector<2x16x16xf32> to vector<2x16xf32>
    %59 = vector.shape_cast %58 : vector<2x16xf32> to vector<2x16x1xf32>
    %60 = tpu.reciprocal %59 {approx = true} : vector<2x16x1xf32> -> vector<2x16x1xf32>
    %61 = vector.broadcast %60 : vector<2x16x1xf32> to vector<2x16x16xf32>
    %62 = arith.mulf %57, %61 : vector<2x16x16xf32>
    %63 = arith.truncf %62 : vector<2x16x16xf32> to vector<2x16x16xbf16>
    %64 = arith.truncf %39 : vector<2x16x128xf32> to vector<2x16x128xbf16>
    %cst_22 = arith.constant dense<0.000000e+00> : vector<2x16x128xf32>
    %65 = tpu.matmul %63, %64, %cst_22 {dimension_numbers = #tpu.dot_dimension_numbers<[2], [1], [1], [2], [0, 0, 0, 1, 1, 2], [0], [0]>} : vector<2x16x16xbf16>, vector<2x16x128xbf16>, vector<2x16x128xf32> -> vector<2x16x128xf32>
    %66 = vector.shape_cast %65 : vector<2x16x128xf32> to vector<32x128xf32>
    %67 = arith.truncf %66 : vector<32x128xf32> to vector<32x128xbf16>
    %c0_23 = arith.constant 0 : index
    %c0_24 = arith.constant 0 : index
    %68 = vector.load %arg8[%c0_23, %c0_24] : memref<128x128xbf16, #tpu.memory_space<vmem>>, vector<128x128xbf16>
    %cst_25 = arith.constant dense<0.000000e+00> : vector<32x128xf32>
    %69 = tpu.matmul %67, %68, %cst_25 {dimension_numbers = #tpu.dot_dimension_numbers<[1], [0], [0], [1], [0, 0, 1, 1], [], []>} : vector<32x128xbf16>, vector<128x128xbf16>, vector<32x128xf32> -> vector<32x128xf32>
    %70 = arith.addf %5, %69 : vector<32x128xf32>
    %c0_26 = arith.constant 0 : index
    %c0_27 = arith.constant 0 : index
    %71 = vector.load %arg9[%c0_26, %c0_27] : memref<1x128xf32, #tpu.memory_space<vmem>>, vector<1x128xf32>
    %72 = vector.broadcast %71 : vector<1x128xf32> to vector<32x128xf32>
    %73 = arith.addf %70, %72 : vector<32x128xf32>
    %c0_28 = arith.constant 0 : index
    %c0_29 = arith.constant 0 : index
    %74 = vector.load %arg10[%c0_28, %c0_29] : memref<1x128xf32, #tpu.memory_space<vmem>>, vector<1x128xf32>
    %c0_30 = arith.constant 0 : index
    %c0_31 = arith.constant 0 : index
    %75 = vector.load %arg11[%c0_30, %c0_31] : memref<1x128xf32, #tpu.memory_space<vmem>>, vector<1x128xf32>
    %cst_32 = arith.constant dense<0.000000e+00> : vector<32xf32>
    %76 = vector.multi_reduction <add>, %73, %cst_32 [1] : vector<32x128xf32> to vector<32xf32>
    %77 = vector.shape_cast %76 : vector<32xf32> to vector<32x1xf32>
    %cst_33 = arith.constant 1.280000e+02 : f32
    %78 = vector.broadcast %cst_33 : f32 to vector<32x1xf32>
    %79 = arith.divf %77, %78 : vector<32x1xf32>
    %80 = vector.broadcast %79 : vector<32x1xf32> to vector<32x128xf32>
    %81 = arith.subf %73, %80 : vector<32x128xf32>
    %82 = arith.mulf %81, %81 : vector<32x128xf32>
    %cst_34 = arith.constant dense<0.000000e+00> : vector<32xf32>
    %83 = vector.multi_reduction <add>, %82, %cst_34 [1] : vector<32x128xf32> to vector<32xf32>
    %84 = vector.shape_cast %83 : vector<32xf32> to vector<32x1xf32>
    %cst_35 = arith.constant 1.280000e+02 : f32
    %85 = vector.broadcast %cst_35 : f32 to vector<32x1xf32>
    %86 = arith.divf %84, %85 : vector<32x1xf32>
    %cst_36 = arith.constant 9.99999974E-6 : f32
    %87 = vector.broadcast %cst_36 : f32 to vector<32x1xf32>
    %88 = arith.addf %86, %87 : vector<32x1xf32>
    %89 = math.rsqrt %88 : vector<32x1xf32>
    %90 = vector.broadcast %89 : vector<32x1xf32> to vector<32x128xf32>
    %91 = arith.mulf %81, %90 : vector<32x128xf32>
    %92 = vector.broadcast %74 : vector<1x128xf32> to vector<32x128xf32>
    %93 = arith.mulf %91, %92 : vector<32x128xf32>
    %94 = vector.broadcast %75 : vector<1x128xf32> to vector<32x128xf32>
    %95 = arith.addf %93, %94 : vector<32x128xf32>
    %96 = arith.truncf %95 : vector<32x128xf32> to vector<32x128xbf16>
    %c0_37 = arith.constant 0 : index
    %c0_38 = arith.constant 0 : index
    %97 = vector.load %arg12[%c0_37, %c0_38] : memref<128x512xbf16, #tpu.memory_space<vmem>>, vector<128x512xbf16>
    %cst_39 = arith.constant dense<0.000000e+00> : vector<32x512xf32>
    %98 = tpu.matmul %96, %97, %cst_39 {dimension_numbers = #tpu.dot_dimension_numbers<[1], [0], [0], [1], [0, 0, 1, 1], [], []>} : vector<32x128xbf16>, vector<128x512xbf16>, vector<32x512xf32> -> vector<32x512xf32>
    %c0_40 = arith.constant 0 : index
    %c0_41 = arith.constant 0 : index
    %99 = vector.load %arg13[%c0_40, %c0_41] : memref<1x512xf32, #tpu.memory_space<vmem>>, vector<1x512xf32>
    %100 = vector.broadcast %99 : vector<1x512xf32> to vector<32x512xf32>
    %101 = arith.addf %98, %100 : vector<32x512xf32>
    %cst_42 = arith.constant 1.702000e+00 : f32
    %102 = vector.broadcast %cst_42 : f32 to vector<32x512xf32>
    %103 = arith.mulf %102, %101 : vector<32x512xf32>
    %104 = arith.negf %103 : vector<32x512xf32>
    %105 = math.exp %104 : vector<32x512xf32>
    %cst_43 = arith.constant 1.000000e+00 : f32
    %106 = vector.broadcast %cst_43 : f32 to vector<32x512xf32>
    %107 = arith.addf %106, %105 : vector<32x512xf32>
    %108 = arith.divf %106, %107 : vector<32x512xf32>
    %109 = arith.mulf %101, %108 : vector<32x512xf32>
    %110 = arith.truncf %109 : vector<32x512xf32> to vector<32x512xbf16>
    %c0_44 = arith.constant 0 : index
    %c0_45 = arith.constant 0 : index
    %111 = vector.load %arg14[%c0_44, %c0_45] : memref<512x128xbf16, #tpu.memory_space<vmem>>, vector<512x128xbf16>
    %cst_46 = arith.constant dense<0.000000e+00> : vector<32x128xf32>
    %112 = tpu.matmul %110, %111, %cst_46 {dimension_numbers = #tpu.dot_dimension_numbers<[1], [0], [0], [1], [0, 0, 1, 1], [], []>} : vector<32x512xbf16>, vector<512x128xbf16>, vector<32x128xf32> -> vector<32x128xf32>
    %113 = arith.addf %73, %112 : vector<32x128xf32>
    %c0_47 = arith.constant 0 : index
    %c0_48 = arith.constant 0 : index
    %114 = vector.load %arg15[%c0_47, %c0_48] : memref<1x128xf32, #tpu.memory_space<vmem>>, vector<1x128xf32>
    %115 = vector.broadcast %114 : vector<1x128xf32> to vector<32x128xf32>
    %116 = arith.addf %113, %115 : vector<32x128xf32>
    %c0_49 = arith.constant 0 : index
    %c0_50 = arith.constant 0 : index
    %c0_51 = arith.constant 0 : index
    %117 = vector.load %arg2[%c0_49, %c0_50, %c0_51] : memref<1x2x1xi32, #tpu.memory_space<vmem>>, vector<1x2x1xi32>
    %118 = vector.shape_cast %117 : vector<1x2x1xi32> to vector<2x1xi32>
    %119 = tpu.iota {dimensions = array<i32: 1>} : vector<2x32xi32>
    %120 = tpu.iota {dimensions = array<i32: 0>} : vector<2x32xi32>
    %c16_i32 = arith.constant 16 : i32
    %121 = vector.broadcast %c16_i32 : i32 to vector<2x32xi32>
    %122 = arith.muli %120, %121 : vector<2x32xi32>
    %123 = vector.broadcast %118 : vector<2x1xi32> to vector<2x32xi32>
    %124 = arith.addi %122, %123 : vector<2x32xi32>
    %125 = arith.cmpi eq, %119, %124 : vector<2x32xi32>
    %126 = arith.extui %125 : vector<2x32xi1> to vector<2x32xi32>
    %127 = arith.sitofp %126 : vector<2x32xi32> to vector<2x32xf32>
    %cst_52 = arith.constant dense<0.000000e+00> : vector<2x128xf32>
    %128 = tpu.matmul %127, %116, %cst_52 {dimension_numbers = #tpu.dot_dimension_numbers<[1], [0], [0], [1], [0, 0, 1, 1], [], []>} : vector<2x32xf32>, vector<32x128xf32>, vector<2x128xf32> -> vector<2x128xf32>
    %c0_53 = arith.constant 0 : index
    %c0_54 = arith.constant 0 : index
    %129 = vector.load %arg16[%c0_53, %c0_54] : memref<1x128xf32, #tpu.memory_space<vmem>>, vector<1x128xf32>
    %c0_55 = arith.constant 0 : index
    %c0_56 = arith.constant 0 : index
    %130 = vector.load %arg17[%c0_55, %c0_56] : memref<1x128xf32, #tpu.memory_space<vmem>>, vector<1x128xf32>
    %cst_57 = arith.constant dense<0.000000e+00> : vector<2xf32>
    %131 = vector.multi_reduction <add>, %128, %cst_57 [1] : vector<2x128xf32> to vector<2xf32>
    %132 = vector.shape_cast %131 : vector<2xf32> to vector<2x1xf32>
    %cst_58 = arith.constant 1.280000e+02 : f32
    %133 = vector.broadcast %cst_58 : f32 to vector<2x1xf32>
    %134 = arith.divf %132, %133 : vector<2x1xf32>
    %135 = vector.broadcast %134 : vector<2x1xf32> to vector<2x128xf32>
    %136 = arith.subf %128, %135 : vector<2x128xf32>
    %137 = arith.mulf %136, %136 : vector<2x128xf32>
    %cst_59 = arith.constant dense<0.000000e+00> : vector<2xf32>
    %138 = vector.multi_reduction <add>, %137, %cst_59 [1] : vector<2x128xf32> to vector<2xf32>
    %139 = vector.shape_cast %138 : vector<2xf32> to vector<2x1xf32>
    %cst_60 = arith.constant 1.280000e+02 : f32
    %140 = vector.broadcast %cst_60 : f32 to vector<2x1xf32>
    %141 = arith.divf %139, %140 : vector<2x1xf32>
    %cst_61 = arith.constant 9.99999974E-6 : f32
    %142 = vector.broadcast %cst_61 : f32 to vector<2x1xf32>
    %143 = arith.addf %141, %142 : vector<2x1xf32>
    %144 = math.rsqrt %143 : vector<2x1xf32>
    %145 = vector.broadcast %144 : vector<2x1xf32> to vector<2x128xf32>
    %146 = arith.mulf %136, %145 : vector<2x128xf32>
    %147 = vector.broadcast %129 : vector<1x128xf32> to vector<2x128xf32>
    %148 = arith.mulf %146, %147 : vector<2x128xf32>
    %149 = vector.broadcast %130 : vector<1x128xf32> to vector<2x128xf32>
    %150 = arith.addf %148, %149 : vector<2x128xf32>
    %151 = arith.truncf %150 : vector<2x128xf32> to vector<2x128xbf16>
    %c0_62 = arith.constant 0 : index
    %c0_63 = arith.constant 0 : index
    %152 = vector.load %arg18[%c0_62, %c0_63] : memref<128x128xbf16, #tpu.memory_space<vmem>>, vector<128x128xbf16>
    %cst_64 = arith.constant dense<0.000000e+00> : vector<2x128xf32>
    %153 = tpu.matmul %151, %152, %cst_64 {dimension_numbers = #tpu.dot_dimension_numbers<[1], [0], [0], [1], [0, 0, 1, 1], [], []>} : vector<2x128xbf16>, vector<128x128xbf16>, vector<2x128xf32> -> vector<2x128xf32>
    %154 = arith.mulf %153, %153 : vector<2x128xf32>
    %cst_65 = arith.constant dense<0.000000e+00> : vector<2xf32>
    %155 = vector.multi_reduction <add>, %154, %cst_65 [1] : vector<2x128xf32> to vector<2xf32>
    %156 = vector.shape_cast %155 : vector<2xf32> to vector<2x1xf32>
    %cst_66 = arith.constant 9.99999996E-13 : f32
    %157 = vector.broadcast %cst_66 : f32 to vector<2x1xf32>
    %158 = arith.addf %156, %157 : vector<2x1xf32>
    %159 = math.rsqrt %158 : vector<2x1xf32>
    %160 = vector.broadcast %159 : vector<2x1xf32> to vector<2x128xf32>
    %161 = arith.mulf %153, %160 : vector<2x128xf32>
    %162 = arith.truncf %161 : vector<2x128xf32> to vector<2x128xbf16>
    %c0_67 = arith.constant 0 : index
    %c0_68 = arith.constant 0 : index
    %c0_69 = arith.constant 0 : index
    %163 = vector.load %arg19[%c0_67, %c0_68, %c0_69] : memref<1x2x128xbf16, #tpu.memory_space<vmem>>, vector<1x2x128xbf16>
    %164 = vector.shape_cast %163 : vector<1x2x128xbf16> to vector<2x128xbf16>
    %165 = vector.shape_cast %162 : vector<2x128xbf16> to vector<1x2x128xbf16>
    tpu.vector_store %arg19[%c0_67, %c0_68, %c0_69], %165 {strides = array<i32>} : memref<1x2x128xbf16, #tpu.memory_space<vmem>>, vector<1x2x128xbf16>,
    return
  }
  func.func @transform_0(%arg0: i32) -> (i32, i32, i32) {
    %c0_i32 = arith.constant 0 : i32
    %c0_i32_0 = arith.constant 0 : i32
    %c0_i32_1 = arith.constant 0 : i32
    return %arg0, %c0_i32, %c0_i32_0 : i32, i32, i32
  }
  func.func @transform_1(%arg0: i32) -> (i32, i32, i32) {
    %c0_i32 = arith.constant 0 : i32
    %c0_i32_0 = arith.constant 0 : i32
    %c0_i32_1 = arith.constant 0 : i32
    return %arg0, %c0_i32, %c0_i32_0 : i32, i32, i32
  }
  func.func @transform_2(%arg0: i32) -> (i32, i32) {
    %c0_i32 = arith.constant 0 : i32
    %c0_i32_0 = arith.constant 0 : i32
    %c0_i32_1 = arith.constant 0 : i32
    return %c0_i32, %c0_i32_0 : i32, i32
  }
  func.func @transform_3(%arg0: i32) -> (i32, i32) {
    %c0_i32 = arith.constant 0 : i32
    %c0_i32_0 = arith.constant 0 : i32
    %c0_i32_1 = arith.constant 0 : i32
    return %c0_i32, %c0_i32_0 : i32, i32
  }
  func.func @transform_4(%arg0: i32) -> (i32, i32) {
    %c0_i32 = arith.constant 0 : i32
    %c0_i32_0 = arith.constant 0 : i32
    %c0_i32_1 = arith.constant 0 : i32
    return %c0_i32, %c0_i32_0 : i32, i32
  }
  func.func @transform_5(%arg0: i32) -> (i32, i32) {
    %c0_i32 = arith.constant 0 : i32
    %c0_i32_0 = arith.constant 0 : i32
    %c0_i32_1 = arith.constant 0 : i32
    return %c0_i32, %c0_i32_0 : i32, i32
  }
  func.func @transform_6(%arg0: i32) -> (i32, i32) {
    %c0_i32 = arith.constant 0 : i32
    %c0_i32_0 = arith.constant 0 : i32
    %c0_i32_1 = arith.constant 0 : i32
    return %c0_i32, %c0_i32_0 : i32, i32
  }
  func.func @transform_7(%arg0: i32) -> (i32, i32) {
    %c0_i32 = arith.constant 0 : i32
    %c0_i32_0 = arith.constant 0 : i32
    %c0_i32_1 = arith.constant 0 : i32
    return %c0_i32, %c0_i32_0 : i32, i32
  }
  func.func @transform_8(%arg0: i32) -> (i32, i32) {
    %c0_i32 = arith.constant 0 : i32
    %c0_i32_0 = arith.constant 0 : i32
    %c0_i32_1 = arith.constant 0 : i32
    return %c0_i32, %c0_i32_0 : i32, i32
  }
  func.func @transform_9(%arg0: i32) -> (i32, i32) {
    %c0_i32 = arith.constant 0 : i32
    %c0_i32_0 = arith.constant 0 : i32
    %c0_i32_1 = arith.constant 0 : i32
    return %c0_i32, %c0_i32_0 : i32, i32
  }
  func.func @transform_10(%arg0: i32) -> (i32, i32) {
    %c0_i32 = arith.constant 0 : i32
    %c0_i32_0 = arith.constant 0 : i32
    %c0_i32_1 = arith.constant 0 : i32
    return %c0_i32, %c0_i32_0 : i32, i32
  }
  func.func @transform_11(%arg0: i32) -> (i32, i32) {
    %c0_i32 = arith.constant 0 : i32
    %c0_i32_0 = arith.constant 0 : i32
    %c0_i32_1 = arith.constant 0 : i32
    return %c0_i32, %c0_i32_0 : i32, i32
  }
  func.func @transform_12(%arg0: i32) -> (i32, i32) {
    %c0_i32 = arith.constant 0 : i32
    %c0_i32_0 = arith.constant 0 : i32
    %c0_i32_1 = arith.constant 0 : i32
    return %c0_i32, %c0_i32_0 : i32, i32
  }
  func.func @transform_13(%arg0: i32) -> (i32, i32) {
    %c0_i32 = arith.constant 0 : i32
    %c0_i32_0 = arith.constant 0 : i32
    %c0_i32_1 = arith.constant 0 : i32
    return %c0_i32, %c0_i32_0 : i32, i32
  }
  func.func @transform_14(%arg0: i32) -> (i32, i32) {
    %c0_i32 = arith.constant 0 : i32
    %c0_i32_0 = arith.constant 0 : i32
    %c0_i32_1 = arith.constant 0 : i32
    return %c0_i32, %c0_i32_0 : i32, i32
  }
  func.func @transform_15(%arg0: i32) -> (i32, i32) {
    %c0_i32 = arith.constant 0 : i32
    %c0_i32_0 = arith.constant 0 : i32
    %c0_i32_1 = arith.constant 0 : i32
    return %c0_i32, %c0_i32_0 : i32, i32
  }
  func.func @transform_16(%arg0: i32) -> (i32, i32) {
    %c0_i32 = arith.constant 0 : i32
    %c0_i32_0 = arith.constant 0 : i32
    %c0_i32_1 = arith.constant 0 : i32
    return %c0_i32, %c0_i32_0 : i32, i32
  }
  func.func @transform_17(%arg0: i32) -> (i32, i32) {
    %c0_i32 = arith.constant 0 : i32
    %c0_i32_0 = arith.constant 0 : i32
    %c0_i32_1 = arith.constant 0 : i32
    return %c0_i32, %c0_i32_0 : i32, i32
  }
  func.func @transform_18(%arg0: i32) -> (i32, i32, i32) {
    %c0_i32 = arith.constant 0 : i32
    %c0_i32_0 = arith.constant 0 : i32
    %c0_i32_1 = arith.constant 0 : i32
    return %arg0, %c0_i32, %c0_i32_0 : i32, i32, i32
  }
}

</mosaic_0001>

<bundles_post_ra>
// kernel: tpu_custom_call.1
= control target key start
LH: loop header
LB: loop body
LE: loop exit
PB: predicated region body
PF: predicated region fallthrough
CT: control target
= control target key end

     0   :  { %s5406_s0 = inlined_call_operand.hbm [shape: f32[4,16,128], index: 0, kind: input, shape index: {}]   ;;  %s5407_s1 = inlined_call_operand.hbm [shape: s32[2,2,1], index: 1, kind: input, shape index: {}]   ;;  %s5408_s2 = inlined_call_operand.hbm [shape: f32[16,128], index: 2, kind: input, shape index: {}]   ;;  %s5409_s3 = inlined_call_operand.hbm [shape: f32[1,128], index: 3, kind: input, shape index: {}]   ;;  %s5410_s4 = inlined_call_operand.hbm [shape: f32[1,128], index: 4, kind: input, shape index: {}]   ;;  %s5411_s5 = inlined_call_operand.hbm [shape: bf16[128,384], index: 5, kind: input, shape index: {}]   ;;  %s5412_s6 = inlined_call_operand.hbm [shape: f32[1,384], index: 6, kind: input, shape index: {}]   ;;  %s5413_s7 = inlined_call_operand.hbm [shape: bf16[128,128], index: 7, kind: input, shape index: {}]   ;;  %s5414_s8 = inlined_call_operand.hbm [shape: f32[1,128], index: 8, kind: input, shape index: {}]   ;;  %s5415_s9 = inlined_call_operand.hbm [shape: f32[1,128], index: 9, kind: input, shape index: {}]   ;;  %s5416_s10 = inlined_call_operand.hbm [shape: f32[1,128], index: 10, kind: input, shape index: {}]   ;;  %s5417_s11 = inlined_call_operand.hbm [shape: bf16[128,512], index: 11, kind: input, shape index: {}]   ;;  %s5418_s12 = inlined_call_operand.hbm [shape: f32[1,512], index: 12, kind: input, shape index: {}]   ;;  %s5419_s13 = inlined_call_operand.hbm [shape: bf16[512,128], index: 13, kind: input, shape index: {}]   ;;  %s5420_s14 = inlined_call_operand.hbm [shape: f32[1,128], index: 14, kind: input, shape index: {}]   ;;  %s5421_s15 = inlined_call_operand.hbm [shape: f32[1,128], index: 15, kind: input, shape index: {}]   ;;  %s5422_s16 = inlined_call_operand.hbm [shape: f32[1,128], index: 16, kind: input, shape index: {}]   ;;  %s5423_s17 = inlined_call_operand.hbm [shape: bf16[128,128], index: 17, kind: input, shape index: {}]   ;;  %s5424_s18 = inlined_call_operand.hbm [shape: bf16[2,2,128], index: 18, kind: output, shape index: {}]  }
   0x1   :  { %5450 = sst [smem:[#allocation50_spill]] %s5406_s0 }
   0x2   :  { %5451 = sst [smem:[#allocation51_spill]] %s5407_s1 }
   0x3   :  { %5452 = sst [smem:[#allocation52_spill]] %s5408_s2 }
   0x4   :  { %5453 = sst [smem:[#allocation53_spill]] %s5409_s3 }
   0x5   :  { %5454 = sst [smem:[#allocation54_spill]] %s5410_s4 }
   0x6   :  { %5455 = sst [smem:[#allocation55_spill]] %s5411_s5 }
   0x7   :  { %5456 = sst [smem:[#allocation56_spill]] %s5412_s6 }
   0x8   :  { %5457 = sst [smem:[#allocation57_spill]] %s5413_s7 }
   0x9   :  { %5458 = sst [smem:[#allocation58_spill]] %s5414_s8 }
   0xa   :  { %5459 = sst [smem:[#allocation59_spill]] %s5415_s9 }
   0xb   :  { %5460 = sst [smem:[#allocation60_spill]] %s5416_s10 }
   0xc   :  { %5461 = sst [smem:[#allocation61_spill]] %s5423_s17 }
   0xd   :  { %5462 = sst [smem:[#allocation62_spill]] %s5424_s18 }
   0xe   :  { %23 = vsyncpa [#allocation3], 0 }
   0xf   :  { %25 = vsyncpa [#allocation3 + $0x1], 0 }
  0x10   :  { %26 = vsyncpa [#allocation6], 0 }
  0x11   :  { %28 = vsyncpa [#allocation6 + $0x1], 0 }
  0x12   :  { %29 = vsyncpa [#allocation9], 0 }
  0x13   :  { %30 = vsyncpa [#allocation12], 0 }
  0x14   :  { %31 = vsyncpa [#allocation15], 0 }
  0x15   :  { %32 = vsyncpa [#allocation18], 0 }
  0x16   :  { %33 = vsyncpa [#allocation21], 0 }
  0x17   :  { %34 = vsyncpa [#allocation24], 0 }
  0x18   :  { %35 = vsyncpa [#allocation27], 0 }
  0x19   :  { %36 = vsyncpa [#allocation30], 0 }
  0x1a   :  { %37 = vsyncpa [#allocation4], 0 }
  0x1b   :  { %39 = vsyncpa [#allocation4 + $0x1], 0  ;;  %s4524_s27 = smov 0   ;;  %s4526_s28 = smov 0  }
  0x1c   :  { %s4528_s29 = smov 0   ;;  %s4530_s30 = smov 0  }
  0x1d LB: > { %5463 = sst [smem:[#allocation44_spill]] %s4384_s27  ;;  %s4398_s0 = smov [#allocation7]   ;;  %s4396_s30 = sphi %s4530_s30, %s4939_s30   ;;  %s4392_s29 = sphi %s4528_s29, %s5533_s29   ;;  %s4388_s28 = sphi %s4526_s28, %s5532_s28   ;;  %s4384_s27 = sphi %s4524_s27, %s5531_s27  }
  0x1e   : > { %5464 = sst [smem:[#allocation45_spill]] %s4388_s28  ;;  %s476_s19 = sshll.u32 %s4398_s0, 4  ;;  %s4550_s19 = int_to_ptr.vmem [resolvable:$true] %s476_s19 }
  0x1f   : > { %5465 = sst [smem:[#allocation46_spill]] %s4392_s29  ;;  %s4545_s1 = sadd.s32 4294967295, %s4396_s30  }
  0x20   : > { %5466 = sst [smem:[#allocation47_spill]] %s4396_s30  ;;  %p2950_p0 = scmp.ge.s32.totalorder %s4396_s30, 1 }
  0x21   : > { %5467 = sst [smem:[#allocation48_spill]] %s4545_s1  ;;  %p5440_p1 = scmp.eq.s32.totalorder %s4545_s1, 0 }
  0x22   : > { %p464_p2 = scmp.lt.s32.totalorder %s4396_s30, 3  ;;  %s4399_s21 = smov [#allocation8]  }
  0x23   : > { %s490_s22 = sshll.u32 %s4399_s21, 4  ;;  %s4400_s23 = smov [#allocation11]   ;;  %s4565_s22 = int_to_ptr.vmem [resolvable:$true] %s490_s22 }
  0x24   : > { %p4552_p3 = pnand %p2950_p0, %p464_p2  ;;  %s511_s24 = sshll.u32 %s4400_s23, 4  ;;  %s4567_s24 = int_to_ptr.vmem [resolvable:$true] %s511_s24 }
  0x25   : > { %s5471_s0 = sld [smem:[#allocation52_spill]] }
  0x26   : > { %s5468_s20 = scalar_select %p4552_p3, 1, 0 }
  0x27   : > { %p3399_p5 = pneg %p4552_p3 }
  0x28   : > { %5469 = sst [smem:[#allocation49_spill]] %s5468_s20 }
  0x29   : > { %p4561_p6 = pnand %p3399_p5, %p5440_p1 }
  0x2b   : > { %s3782_s18 = scalar_lea.hbm %s5471_s0, 256  ;;  %p4577_p8 = pneg %p4561_p6 }
  0x2c   : > { %p3783_p7 = scmp.ne.s32.totalorder %s5471_s0, %s3782_s18  ;;  %p3789_p11 = scmp.lt.u32.totalorder %s3782_s18, %s5471_s0 }
  0x2e   : > { %p3785_p9 = pnand %p4577_p8, %p3783_p7 }
  0x30   : > { %p3786_p10 = pneg %p3785_p9 }
  0x32   : > { %p3791_p12 = pnand %p3789_p11, %p3786_p10 }
  0x34   : > { %3794 = shalt.err (!%p3791_p12)
}
  0x35   : > { %s3795_s27 = scalar_lea.vmem %s4550_s19, 256  ;;  %p3803_p5 = scmp.lt.s32.totalorder %s4550_s19, %s4550_s19 }
  0x36   : > { %p3796_p13 = scmp.ne.s32.totalorder %s4550_s19, %s3795_s27  ;;  %p3804_p4 = scmp.lt.s32.totalorder %s3795_s27, %s3795_s27 }
  0x38   : > { %p3798_p0 = pnand %p3796_p13, %p4577_p8  ;;  %p3805_p7 = por %p3804_p4, %p3803_p5 }
  0x3a   : > { %p3799_p2 = pneg %p3798_p0 }
  0x3c   : > { %p3806_p9 = pnand %p3805_p7, %p3799_p2 }
  0x3e   : > { %3809 = shalt.err (!%p3806_p9)
}
  0x3f   : > { %s5438_s20 = smov 128   ;;  %s5439_s18 = smov 8  }
  0x40   : > { %3402 = dma.hbm_to_vmem [thread:$0]  (!%p4561_p6), %s5471_s0, 256, %s4550_s19, [#allocation6], %s5438_s20, %s5438_s20, %s5439_s18  }
  0x41   : > { %s5473_s3 = sld [smem:[#allocation53_spill]] }
  0x47   : > { %s3810_s27 = scalar_lea.hbm %s5473_s3, 16 }
  0x48   : > { %p3811_p4 = scmp.ne.s32.totalorder %s5473_s3, %s3810_s27  ;;  %p3817_p12 = scmp.lt.u32.totalorder %s3810_s27, %s5473_s3 }
  0x4a   : > { %p3813_p10 = pnand %p3811_p4, %p4577_p8 }
  0x4c   : > { %p3814_p11 = pneg %p3813_p10 }
  0x4e   : > { %p3819_p13 = pnand %p3817_p12, %p3814_p11 }
  0x50   : > { %3822 = shalt.err (!%p3819_p13)
}
  0x51   : > { %s3823_s19 = scalar_lea.vmem %s4565_s22, 16  ;;  %s3830_s28 = scalar_lea.vmem %s4565_s22, 32 }
  0x52   : > { %p3824_p0 = scmp.ne.s32.totalorder %s4565_s22, %s3823_s19  ;;  %p3831_p7 = scmp.lt.s32.totalorder %s4565_s22, %s4565_s22 }
  0x53   : > { %p3832_p9 = scmp.lt.s32.totalorder %s3830_s28, %s3823_s19 }
  0x54   : > { %p3826_p2 = pnand %p3824_p0, %p4577_p8 }
  0x55   : > { %p3833_p4 = por %p3832_p9, %p3831_p7 }
  0x56   : > { %p3827_p5 = pneg %p3826_p2 }
  0x58   : > { %p3834_p10 = pnand %p3833_p4, %p3827_p5 }
  0x5a   : > { %3837 = shalt.err (!%p3834_p10)
}
  0x5b   : > { %3405 = dma.hbm_to_vmem [thread:$0]  (!%p4561_p6), %s5473_s3, 16, %s4565_s22, [#allocation9]  }
  0x5c   : > { %s5474_s5 = sld [smem:[#allocation55_spill]] }
  0x62   : > { %s3838_s25 = scalar_lea.hbm %s5474_s5, 3072 }
  0x63   : > { %p3839_p11 = scmp.ne.s32.totalorder %s5474_s5, %s3838_s25  ;;  %p3845_p0 = scmp.lt.u32.totalorder %s3838_s25, %s5474_s5 }
  0x65   : > { %p3841_p12 = pnand %p3839_p11, %p4577_p8 }
  0x67   : > { %p3842_p13 = pneg %p3841_p12 }
  0x69   : > { %p3847_p2 = pnand %p3845_p0, %p3842_p13 }
  0x6b   : > { %3850 = shalt.err (!%p3847_p2)
}
  0x6c   : > { %s3851_s22 = scalar_lea.vmem %s4567_s24, 3072  ;;  %p3859_p4 = scmp.lt.s32.totalorder %s4567_s24, %s4567_s24 }
  0x6d   : > { %p3852_p5 = scmp.ne.s32.totalorder %s4567_s24, %s3851_s22  ;;  %p3860_p10 = scmp.lt.s32.totalorder %s3851_s22, %s3851_s22 }
  0x6f   : > { %p3854_p7 = pnand %p3852_p5, %p4577_p8  ;;  %p3861_p11 = por %p3860_p10, %p3859_p4 }
  0x71   : > { %p3855_p9 = pneg %p3854_p7 }
  0x73   : > { %p3862_p12 = pnand %p3861_p11, %p3855_p9 }
  0x75   : > { %3865 = shalt.err (!%p3862_p12)
}
  0x76   : > { %s4403_s28 = smov 192   ;;  %s4404_s17 = smov 12  }
  0x77   : > { %3411 = dma.hbm_to_vmem [thread:$0]  (!%p4561_p6), %s5474_s5, 3072, %s4567_s24, [#allocation12], %s4403_s28, %s4403_s28, %s4404_s17  }
  0x78   : > { %s4405_s1 = smov [#allocation14]   ;;  %s5475_s7 = sld [smem:[#allocation57_spill]] }
  0x79   : > { %s535_s25 = sshll.u32 %s4405_s1, 4  ;;  %s536_s25 = int_to_ptr.vmem [resolvable:$true] %s535_s25 }
  0x7e   : > { %s3866_s27 = scalar_lea.hbm %s5475_s7, 1024 }
  0x7f   : > { %p3867_p13 = scmp.ne.s32.totalorder %s5475_s7, %s3866_s27  ;;  %p3873_p5 = scmp.lt.u32.totalorder %s3866_s27, %s5475_s7 }
  0x81   : > { %p3869_p0 = pnand %p3867_p13, %p4577_p8 }
  0x83   : > { %p3870_p2 = pneg %p3869_p0 }
  0x85   : > { %p3875_p7 = pnand %p3873_p5, %p3870_p2 }
  0x87   : > { %3878 = shalt.err (!%p3875_p7)
}
  0x88   : > { %s3879_s24 = scalar_lea.vmem %s536_s25, 1024  ;;  %p3887_p11 = scmp.lt.s32.totalorder %s536_s25, %s536_s25 }
  0x89   : > { %p3880_p9 = scmp.ne.s32.totalorder %s536_s25, %s3879_s24  ;;  %p3888_p12 = scmp.lt.s32.totalorder %s3879_s24, %s3879_s24 }
  0x8b   : > { %p3882_p4 = pnand %p3880_p9, %p4577_p8  ;;  %p3889_p1 = por %p3888_p12, %p3887_p11 }
  0x8d   : > { %p3883_p10 = pneg %p3882_p4 }
  0x8f   : > { %p3890_p3 = pnand %p3889_p1, %p3883_p10 }
  0x91   : > { %3893 = shalt.err (!%p3890_p3)
}
  0x92   : > { %s5442_s28 = smov 64   ;;  %s5444_s17 = smov 4  }
  0x93   : > { %3417 = dma.hbm_to_vmem [thread:$0]  (!%p4561_p6), %s5475_s7, 1024, %s536_s25, [#allocation15], %s5442_s28, %s5442_s28, %s5444_s17  }
  0x94   : > { %s4408_s29 = smov [#allocation17]   ;;  %s4409_s1 = smov [#allocation20]  }
  0x95   : > { %s560_s30 = sshll.u32 %s4408_s29, 4  ;;  %s581_s26 = sshll.u32 %s4409_s1, 4  ;;  %s561_s30 = int_to_ptr.vmem [resolvable:$true] %s560_s30  ;;  %s4669_s26 = int_to_ptr.vmem [resolvable:$true] %s581_s26 }
  0x96   : > { %s5476_s9 = sld [smem:[#allocation59_spill]] }
  0x9c   : > { %s3894_s19 = scalar_lea.hbm %s5476_s9, 16 }
  0x9d   : > { %p3895_p1 = scmp.ne.s32.totalorder %s5476_s9, %s3894_s19  ;;  %p3901_p0 = scmp.lt.u32.totalorder %s3894_s19, %s5476_s9 }
  0x9f   : > { %p3897_p3 = pnand %p3895_p1, %p4577_p8 }
  0xa1   : > { %p3898_p13 = pneg %p3897_p3 }
  0xa3   : > { %p3903_p2 = pnand %p3901_p0, %p3898_p13 }
  0xa5   : > { %3906 = shalt.err (!%p3903_p2)
}
  0xa6   : > { %s3907_s18 = scalar_lea.vmem %s561_s30, 16  ;;  %s3914_s29 = scalar_lea.vmem %s561_s30, 32 }
  0xa7   : > { %p3908_p5 = scmp.ne.s32.totalorder %s561_s30, %s3907_s18  ;;  %p3915_p4 = scmp.lt.s32.totalorder %s561_s30, %s561_s30 }
  0xa8   : > { %p3916_p10 = scmp.lt.s32.totalorder %s3914_s29, %s3907_s18 }
  0xa9   : > { %p3910_p7 = pnand %p3908_p5, %p4577_p8 }
  0xaa   : > { %p3917_p11 = por %p3916_p10, %p3915_p4 }
  0xab   : > { %p3911_p9 = pneg %p3910_p7 }
  0xad   : > { %p3918_p12 = pnand %p3917_p11, %p3911_p9 }
  0xaf   : > { %3921 = shalt.err (!%p3918_p12)
}
  0xb0   : > { %3423 = dma.hbm_to_vmem [thread:$0]  (!%p4561_p6), %s5476_s9, 16, %s561_s30, [#allocation18]  }
  0xb1   : > { %s3922_s22 = scalar_lea.hbm %s5417_s11, 4096 }
  0xb2   : > { %p3923_p1 = scmp.ne.s32.totalorder %s5417_s11, %s3922_s22  ;;  %p3929_p0 = scmp.lt.u32.totalorder %s3922_s22, %s5417_s11 }
  0xb4   : > { %p3925_p3 = pnand %p3923_p1, %p4577_p8 }
  0xb6   : > { %p3926_p13 = pneg %p3925_p3 }
  0xb8   : > { %p3931_p2 = pnand %p3929_p0, %p3926_p13 }
  0xba   : > { %3934 = shalt.err (!%p3931_p2)
}
  0xbb   : > { %s3935_s30 = scalar_lea.vmem %s4669_s26, 4096  ;;  %p3943_p4 = scmp.lt.s32.totalorder %s4669_s26, %s4669_s26 }
  0xbc   : > { %p3936_p5 = scmp.ne.s32.totalorder %s4669_s26, %s3935_s30  ;;  %p3944_p10 = scmp.lt.s32.totalorder %s3935_s30, %s3935_s30 }
  0xbe   : > { %p3938_p7 = pnand %p3936_p5, %p4577_p8  ;;  %p3945_p11 = por %p3944_p10, %p3943_p4 }
  0xc0   : > { %p3939_p9 = pneg %p3938_p7 }
  0xc2   : > { %p3946_p12 = pnand %p3945_p11, %p3939_p9 }
  0xc4   : > { %3949 = shalt.err (!%p3946_p12)
}
  0xc5   : > { %s4410_s29 = smov 256   ;;  %s4411_s1 = smov 16  }
  0xc6   : > { %3429 = dma.hbm_to_vmem [thread:$0]  (!%p4561_p6), %s5417_s11, 4096, %s4669_s26, [#allocation21], %s4410_s29, %s4410_s29, %s4411_s1  }
  0xc7   : > { %s4412_s19 = smov [#allocation23]   ;;  %s4413_s24 = smov [#allocation26]  }
  0xc8   : > { %s605_s22 = sshll.u32 %s4412_s19, 4  ;;  %s630_s20 = sshll.u32 %s4413_s24, 4  ;;  %s606_s22 = int_to_ptr.vmem [resolvable:$true] %s605_s22  ;;  %s4712_s20 = int_to_ptr.vmem [resolvable:$true] %s630_s20 }
  0xc9   : > { %s3950_s30 = scalar_lea.hbm %s5419_s13, 4096 }
  0xca   : > { %p3951_p1 = scmp.ne.s32.totalorder %s5419_s13, %s3950_s30  ;;  %p3957_p0 = scmp.lt.u32.totalorder %s3950_s30, %s5419_s13 }
  0xcc   : > { %p3953_p3 = pnand %p3951_p1, %p4577_p8 }
  0xce   : > { %p3954_p13 = pneg %p3953_p3 }
  0xd0   : > { %p3959_p2 = pnand %p3957_p0, %p3954_p13 }
  0xd2   : > { %3962 = shalt.err (!%p3959_p2)
}
  0xd3   : > { %s3963_s29 = scalar_lea.vmem %s606_s22, 4096  ;;  %p3971_p4 = scmp.lt.s32.totalorder %s606_s22, %s606_s22 }
  0xd4   : > { %p3964_p5 = scmp.ne.s32.totalorder %s606_s22, %s3963_s29  ;;  %p3972_p10 = scmp.lt.s32.totalorder %s3963_s29, %s3963_s29 }
  0xd6   : > { %p3966_p7 = pnand %p3964_p5, %p4577_p8  ;;  %p3973_p11 = por %p3972_p10, %p3971_p4 }
  0xd8   : > { %p3967_p9 = pneg %p3966_p7 }
  0xda   : > { %p3974_p12 = pnand %p3973_p11, %p3967_p9 }
  0xdc   : > { %3977 = shalt.err (!%p3974_p12)
}
  0xdd   : > { %s5477_s28 = smov 4   ;;  %s5478_s17 = smov 64  }
  0xde   : > { %3435 = dma.hbm_to_vmem [thread:$0]  (!%p4561_p6), %s5419_s13, 4096, %s606_s22, [#allocation24], %s5478_s17, %s5478_s17, %s5477_s28  }
  0xdf   : > { %s3978_s25 = scalar_lea.hbm %s5421_s15, 16 }
  0xe0   : > { %p3979_p1 = scmp.ne.s32.totalorder %s5421_s15, %s3978_s25  ;;  %p3985_p0 = scmp.lt.u32.totalorder %s3978_s25, %s5421_s15 }
  0xe2   : > { %p3981_p3 = pnand %p3979_p1, %p4577_p8 }
  0xe4   : > { %p3982_p13 = pneg %p3981_p3 }
  0xe6   : > { %p3987_p2 = pnand %p3985_p0, %p3982_p13 }
  0xe8   : > { %3990 = shalt.err (!%p3987_p2)
}
  0xe9   : > { %s3991_s22 = scalar_lea.vmem %s4712_s20, 16  ;;  %s3998_s29 = scalar_lea.vmem %s4712_s20, 32 }
  0xea   : > { %p3992_p5 = scmp.ne.s32.totalorder %s4712_s20, %s3991_s22  ;;  %p3999_p4 = scmp.lt.s32.totalorder %s4712_s20, %s4712_s20 }
  0xeb   : > { %p4000_p10 = scmp.lt.s32.totalorder %s3998_s29, %s3991_s22 }
  0xec   : > { %p3994_p7 = pnand %p3992_p5, %p4577_p8 }
  0xed   : > { %p4001_p11 = por %p4000_p10, %p3999_p4 }
  0xee   : > { %p3995_p9 = pneg %p3994_p7 }
  0xf0   : > { %p4002_p12 = pnand %p4001_p11, %p3995_p9 }
  0xf2   : > { %4005 = shalt.err (!%p4002_p12)
}
  0xf3   : > { %3441 = dma.hbm_to_vmem [thread:$0]  (!%p4561_p6), %s5421_s15, 16, %s4712_s20, [#allocation27]  }
  0xf4   : > { %s4414_s19 = smov [#allocation10]   ;;  %s4415_s25 = smov [#allocation13]  }
  0xf5   : > { %s501_s24 = sshll.u32 %s4414_s19, 4  ;;  %s525_s18 = sshll.u32 %s4415_s25, 4  ;;  %s502_s24 = int_to_ptr.vmem [resolvable:$true] %s501_s24  ;;  %s4759_s18 = int_to_ptr.vmem [resolvable:$true] %s525_s18 }
  0xf6   : > { %s5479_s4 = sld [smem:[#allocation54_spill]] }
  0xfc   : > { %s4006_s26 = scalar_lea.hbm %s5479_s4, 16 }
  0xfd   : > { %p4007_p1 = scmp.ne.s32.totalorder %s5479_s4, %s4006_s26  ;;  %p4013_p0 = scmp.lt.u32.totalorder %s4006_s26, %s5479_s4 }
  0xff   : > { %p4009_p3 = pnand %p4007_p1, %p4577_p8 }
 0x101   : > { %p4010_p13 = pneg %p4009_p3 }
 0x103   : > { %p4015_p2 = pnand %p4013_p0, %p4010_p13 }
 0x105   : > { %4018 = shalt.err (!%p4015_p2)
}
 0x106   : > { %s4019_s27 = scalar_lea.vmem %s502_s24, 16  ;;  %s4026_s19 = scalar_lea.vmem %s502_s24, 32 }
 0x107   : > { %p4020_p5 = scmp.ne.s32.totalorder %s502_s24, %s4019_s27  ;;  %p4027_p4 = scmp.lt.s32.totalorder %s502_s24, %s502_s24 }
 0x108   : > { %p4028_p10 = scmp.lt.s32.totalorder %s4026_s19, %s4019_s27 }
 0x109   : > { %p4022_p7 = pnand %p4020_p5, %p4577_p8 }
 0x10a   : > { %p4029_p11 = por %p4028_p10, %p4027_p4 }
 0x10b   : > { %p4023_p9 = pneg %p4022_p7 }
 0x10d   : > { %p4030_p12 = pnand %p4029_p11, %p4023_p9 }
 0x10f   : > { %4033 = shalt.err (!%p4030_p12)
}
 0x110   : > { %3408 = dma.hbm_to_vmem [thread:$0]  (!%p4561_p6), %s5479_s4, 16, %s502_s24, [#allocation9]  }
 0x111   : > { %s5480_s6 = sld [smem:[#allocation56_spill]] }
 0x117   : > { %s4034_s22 = scalar_lea.hbm %s5480_s6, 48 }
 0x118   : > { %p4035_p1 = scmp.ne.s32.totalorder %s5480_s6, %s4034_s22  ;;  %p4041_p0 = scmp.lt.u32.totalorder %s4034_s22, %s5480_s6 }
 0x11a   : > { %p4037_p3 = pnand %p4035_p1, %p4577_p8 }
 0x11c   : > { %p4038_p13 = pneg %p4037_p3 }
 0x11e   : > { %p4043_p2 = pnand %p4041_p0, %p4038_p13 }
 0x120   : > { %4046 = shalt.err (!%p4043_p2)
}
 0x121   : > { %s4047_s24 = scalar_lea.vmem %s4759_s18, 48  ;;  %s4054_s19 = scalar_lea.vmem %s4759_s18, 64 }
 0x122   : > { %p4048_p5 = scmp.ne.s32.totalorder %s4759_s18, %s4047_s24  ;;  %p4055_p4 = scmp.lt.s32.totalorder %s4759_s18, %s4759_s18 }
 0x123   : > { %p4056_p10 = scmp.lt.s32.totalorder %s4054_s19, %s4047_s24 }
 0x124   : > { %p4050_p7 = pnand %p4048_p5, %p4577_p8 }
 0x125   : > { %p4057_p11 = por %p4056_p10, %p4055_p4 }
 0x126   : > { %p4051_p9 = pneg %p4050_p7 }
 0x128   : > { %p4058_p12 = pnand %p4057_p11, %p4051_p9 }
 0x12a   : > { %4061 = shalt.err (!%p4058_p12)
}
 0x12b   : > { %3414 = dma.hbm_to_vmem [thread:$0]  (!%p4561_p6), %s5480_s6, 48, %s4759_s18, [#allocation12]  }
 0x12c   : > { %s4416_s23 = smov [#allocation16]   ;;  %s4417_s22 = smov [#allocation19]  }
 0x12d   : > { %s549_s26 = sshll.u32 %s4416_s23, 4  ;;  %s571_s29 = sshll.u32 %s4417_s22, 4  ;;  %s550_s26 = int_to_ptr.vmem [resolvable:$true] %s549_s26  ;;  %s4803_s29 = int_to_ptr.vmem [resolvable:$true] %s571_s29 }
 0x12e   : > { %s5481_s8 = sld [smem:[#allocation58_spill]] }
 0x134   : > { %s4062_s27 = scalar_lea.hbm %s5481_s8, 16 }
 0x135   : > { %p4063_p1 = scmp.ne.s32.totalorder %s5481_s8, %s4062_s27  ;;  %p4069_p0 = scmp.lt.u32.totalorder %s4062_s27, %s5481_s8 }
 0x137   : > { %p4065_p3 = pnand %p4063_p1, %p4577_p8 }
 0x139   : > { %p4066_p13 = pneg %p4065_p3 }
 0x13b   : > { %p4071_p2 = pnand %p4069_p0, %p4066_p13 }
 0x13d   : > { %4074 = shalt.err (!%p4071_p2)
}
 0x13e   : > { %s4075_s30 = scalar_lea.vmem %s550_s26, 16  ;;  %s4082_s23 = scalar_lea.vmem %s550_s26, 32 }
 0x13f   : > { %p4076_p5 = scmp.ne.s32.totalorder %s550_s26, %s4075_s30  ;;  %p4083_p4 = scmp.lt.s32.totalorder %s550_s26, %s550_s26 }
 0x140   : > { %p4084_p10 = scmp.lt.s32.totalorder %s4082_s23, %s4075_s30 }
 0x141   : > { %p4078_p7 = pnand %p4076_p5, %p4577_p8 }
 0x142   : > { %p4085_p11 = por %p4084_p10, %p4083_p4 }
 0x143   : > { %p4079_p9 = pneg %p4078_p7 }
 0x145   : > { %p4086_p12 = pnand %p4085_p11, %p4079_p9 }
 0x147   : > { %4089 = shalt.err (!%p4086_p12)
}
 0x148   : > { %3420 = dma.hbm_to_vmem [thread:$0]  (!%p4561_p6), %s5481_s8, 16, %s550_s26, [#allocation15]  }
 0x149   : > { %s5482_s10 = sld [smem:[#allocation60_spill]] }
 0x14f   : > { %s4090_s24 = scalar_lea.hbm %s5482_s10, 16 }
 0x150   : > { %p4091_p1 = scmp.ne.s32.totalorder %s5482_s10, %s4090_s24  ;;  %p4097_p0 = scmp.lt.u32.totalorder %s4090_s24, %s5482_s10 }
 0x152   : > { %p4093_p3 = pnand %p4091_p1, %p4577_p8 }
 0x154   : > { %p4094_p13 = pneg %p4093_p3 }
 0x156   : > { %p4099_p2 = pnand %p4097_p0, %p4094_p13 }
 0x158   : > { %4102 = shalt.err (!%p4099_p2)
}
 0x159   : > { %s4103_s26 = scalar_lea.vmem %s4803_s29, 16  ;;  %s4110_s23 = scalar_lea.vmem %s4803_s29, 32 }
 0x15a   : > { %p4104_p5 = scmp.ne.s32.totalorder %s4803_s29, %s4103_s26  ;;  %p4111_p4 = scmp.lt.s32.totalorder %s4803_s29, %s4803_s29 }
 0x15b   : > { %p4112_p10 = scmp.lt.s32.totalorder %s4110_s23, %s4103_s26 }
 0x15c   : > { %p4106_p7 = pnand %p4104_p5, %p4577_p8 }
 0x15d   : > { %p4113_p11 = por %p4112_p10, %p4111_p4 }
 0x15e   : > { %p4107_p9 = pneg %p4106_p7 }
 0x160   : > { %p4114_p12 = pnand %p4113_p11, %p4107_p9 }
 0x162   : > { %4117 = shalt.err (!%p4114_p12)
}
 0x163   : > { %3426 = dma.hbm_to_vmem [thread:$0]  (!%p4561_p6), %s5482_s10, 16, %s4803_s29, [#allocation18]  }
 0x164   : > { %s4418_s20 = smov [#allocation22]   ;;  %s4419_s24 = smov [#allocation25]  }
 0x165   : > { %s595_s27 = sshll.u32 %s4418_s20, 4  ;;  %s619_s19 = sshll.u32 %s4419_s24, 4  ;;  %s596_s27 = int_to_ptr.vmem [resolvable:$true] %s595_s27  ;;  %s4847_s19 = int_to_ptr.vmem [resolvable:$true] %s619_s19 }
 0x166   : > { %s4118_s30 = scalar_lea.hbm %s5418_s12, 64 }
 0x167   : > { %p4119_p1 = scmp.ne.s32.totalorder %s5418_s12, %s4118_s30  ;;  %p4125_p0 = scmp.lt.u32.totalorder %s4118_s30, %s5418_s12 }
 0x169   : > { %p4121_p3 = pnand %p4119_p1, %p4577_p8 }
 0x16b   : > { %p4122_p13 = pneg %p4121_p3 }
 0x16d   : > { %p4127_p2 = pnand %p4125_p0, %p4122_p13 }
 0x16f   : > { %4130 = shalt.err (!%p4127_p2)
}
 0x170   : > { %s4131_s1 = scalar_lea.vmem %s596_s27, 64  ;;  %p4139_p4 = scmp.lt.s32.totalorder %s596_s27, %s596_s27 }
 0x171   : > { %p4132_p5 = scmp.ne.s32.totalorder %s596_s27, %s4131_s1  ;;  %p4140_p10 = scmp.lt.s32.totalorder %s4131_s1, %s4131_s1 }
 0x173   : > { %p4134_p7 = pnand %p4132_p5, %p4577_p8  ;;  %p4141_p11 = por %p4140_p10, %p4139_p4 }
 0x175   : > { %p4135_p9 = pneg %p4134_p7 }
 0x177   : > { %p4142_p12 = pnand %p4141_p11, %p4135_p9 }
 0x179   : > { %4145 = shalt.err (!%p4142_p12)
}
 0x17a   : > { %3432 = dma.hbm_to_vmem [thread:$0]  (!%p4561_p6), %s5418_s12, 64, %s596_s27, [#allocation21]  }
 0x17b   : > { %s4146_s30 = scalar_lea.hbm %s5420_s14, 16 }
 0x17c   : > { %p4147_p1 = scmp.ne.s32.totalorder %s5420_s14, %s4146_s30  ;;  %p4153_p0 = scmp.lt.u32.totalorder %s4146_s30, %s5420_s14 }
 0x17e   : > { %p4149_p3 = pnand %p4147_p1, %p4577_p8 }
 0x180   : > { %p4150_p13 = pneg %p4149_p3 }
 0x182   : > { %p4155_p2 = pnand %p4153_p0, %p4150_p13 }
 0x184   : > { %4158 = shalt.err (!%p4155_p2)
}
 0x185   : > { %s4159_s27 = scalar_lea.vmem %s4847_s19, 16  ;;  %s4166_s1 = scalar_lea.vmem %s4847_s19, 32 }
 0x186   : > { %p4160_p5 = scmp.ne.s32.totalorder %s4847_s19, %s4159_s27  ;;  %p4167_p4 = scmp.lt.s32.totalorder %s4847_s19, %s4847_s19 }
 0x187   : > { %p4168_p10 = scmp.lt.s32.totalorder %s4166_s1, %s4159_s27 }
 0x188   : > { %p4162_p7 = pnand %p4160_p5, %p4577_p8 }
 0x189   : > { %p4169_p11 = por %p4168_p10, %p4167_p4 }
 0x18a   : > { %p4163_p9 = pneg %p4162_p7 }
 0x18c   : > { %p4170_p12 = pnand %p4169_p11, %p4163_p9 }
 0x18e   : > { %4173 = shalt.err (!%p4170_p12)
}
 0x18f   : > { %3438 = dma.hbm_to_vmem [thread:$0]  (!%p4561_p6), %s5420_s14, 16, %s4847_s19, [#allocation24]  }
 0x190   : > { %s4420_s25 = smov [#allocation28]   ;;  %s4421_s30 = smov [#allocation29]  }
 0x191   : > { %s641_s18 = sshll.u32 %s4420_s25, 4  ;;  %s651_s26 = sshll.u32 %s4421_s30, 4  ;;  %s642_s18 = int_to_ptr.vmem [resolvable:$true] %s641_s18  ;;  %s4891_s26 = int_to_ptr.vmem [resolvable:$true] %s651_s26 }
 0x192   : > { %s4174_s29 = scalar_lea.hbm %s5422_s16, 16 }
 0x193   : > { %p4175_p1 = scmp.ne.s32.totalorder %s5422_s16, %s4174_s29  ;;  %p4181_p0 = scmp.lt.u32.totalorder %s4174_s29, %s5422_s16 }
 0x195   : > { %p4177_p3 = pnand %p4175_p1, %p4577_p8 }
 0x197   : > { %p4178_p13 = pneg %p4177_p3 }
 0x199   : > { %p4183_p2 = pnand %p4181_p0, %p4178_p13 }
 0x19b   : > { %4186 = shalt.err (!%p4183_p2)
}
 0x19c   : > { %s4187_s24 = scalar_lea.vmem %s642_s18, 16  ;;  %s4194_s25 = scalar_lea.vmem %s642_s18, 32 }
 0x19d   : > { %p4188_p5 = scmp.ne.s32.totalorder %s642_s18, %s4187_s24  ;;  %p4195_p4 = scmp.lt.s32.totalorder %s642_s18, %s642_s18 }
 0x19e   : > { %p4196_p10 = scmp.lt.s32.totalorder %s4194_s25, %s4187_s24 }
 0x19f   : > { %p4190_p7 = pnand %p4188_p5, %p4577_p8 }
 0x1a0   : > { %p4197_p11 = por %p4196_p10, %p4195_p4 }
 0x1a1   : > { %p4191_p9 = pneg %p4190_p7 }
 0x1a3   : > { %p4198_p12 = pnand %p4197_p11, %p4191_p9 }
 0x1a5   : > { %4201 = shalt.err (!%p4198_p12)
}
 0x1a6   : > { %3444 = dma.hbm_to_vmem [thread:$0]  (!%p4561_p6), %s5422_s16, 16, %s642_s18, [#allocation27]  }
 0x1a7   : > { %s5483_s27 = sld [smem:[#allocation61_spill]] }
 0x1ad   : > { %s5484_s1 = smov %s5483_s27  ;;  %s4202_s20 = scalar_lea.hbm %s5483_s27, 1024 }
 0x1ae   : > { %p4203_p1 = scmp.ne.s32.totalorder %s5484_s1, %s4202_s20  ;;  %p4209_p0 = scmp.lt.u32.totalorder %s4202_s20, %s5484_s1 }
 0x1b0   : > { %p4205_p3 = pnand %p4203_p1, %p4577_p8 }
 0x1b2   : > { %p4206_p13 = pneg %p4205_p3 }
 0x1b4   : > { %p4211_p2 = pnand %p4209_p0, %p4206_p13 }
 0x1b6   : > { %4214 = shalt.err (!%p4211_p2)
}
 0x1b7   : > { %s4215_s18 = scalar_lea.vmem %s4891_s26, 1024  ;;  %p4223_p4 = scmp.lt.s32.totalorder %s4891_s26, %s4891_s26 }
 0x1b8   : > { %p4216_p5 = scmp.ne.s32.totalorder %s4891_s26, %s4215_s18  ;;  %p4224_p10 = scmp.lt.s32.totalorder %s4215_s18, %s4215_s18 }
 0x1ba   : > { %p4218_p7 = pnand %p4216_p5, %p4577_p8  ;;  %p4225_p11 = por %p4224_p10, %p4223_p4 }
 0x1bc   : > { %p4219_p9 = pneg %p4218_p7 }
 0x1be   : > { %p4226_p12 = pnand %p4225_p11, %p4219_p9 }
 0x1c0   : > { %4229 = shalt.err (!%p4226_p12)
}
 0x1c1   : > { %s5485_s23 = sld [smem:[#allocation47_spill]]  ;;  %s5486_s21 = sld [smem:[#allocation46_spill]] }
 0x1c2   : > { %s5487_s22 = sld [smem:[#allocation45_spill]]  ;;  %s5488_s29 = sld [smem:[#allocation44_spill]] }
 0x1c3   : > { %s5489_s27 = sld [smem:[#allocation48_spill]] }
 0x1c4   : > { %3447 = dma.hbm_to_vmem [thread:$0]  (!%p4561_p6), %s5484_s1, 1024, %s4891_s26, [#allocation30], %s5478_s17, %s5478_s17, %s5477_s28  }
 0x1c7   : > { %s2949_s2 = sadd.s32 4294967294, %s5485_s23   ;;  %s4939_s30 = sadd.s32 1, %s5485_s23  }
 0x1c8   : > { %s49_s20 = ssub.s32 %s5485_s23, %s4939_s30  ;;  %s52_s19 = sadd.s32 1, %s5486_s21 }
 0x1c9   : > { %p50_p8 = scmp.eq.s32.totalorder %s49_s20, 0  ;;  %p59_p1 = scmp.ne.s32.totalorder %s5486_s21, %s5487_s22 }
 0x1ca   : > { %p60_p3 = scmp.eq.s32.totalorder %s5485_s23, 0  ;;  %p65_p13 = scmp.ne.s32.totalorder %s5487_s22, %s5488_s29 }
 0x1cb   : > { %s4950_s24 = scalar_select %p50_p8, %s5486_s21, %s52_s19  }
 0x1cc   : > { %p4952_p0 = por %p60_p3, %p59_p1  ;;  %p5491_p2 = scmp.eq.s32.totalorder %s5489_s27, 0 }
 0x1cd   : > { %p451_p5 = scmp.eq.s32.totalorder %s5489_s27, 1  ;;  %p457_p7 = scmp.eq.s32.totalorder %s2949_s2, 1 }
 0x1ce   : > { %p4958_p6 = por %p5491_p2, %p65_p13  ;;  %p3475_p9 = scmp.lt.s32.totalorder %s5485_s23, 2 }
 0x1cf   : > { %s4965_s17 = sand.u32 1, %s5486_s21   ;;  %p4967_p4 = por %p451_p5, %p59_p1 }
 0x1d0   : > { %s5492_s28 = scalar_select %p4958_p6, 1, 0 }
 0x1d1   : > { %s5493_s26 = scalar_select %p4967_p4, 1, 0 }
 0x1d2   : > { %p4971_p10 = por %p457_p7, %p65_p13  ;;  %s2968_s0 = sshll.u32 %s4965_s17, 5 }
 0x1d3   : > { %s3129_s22 = sshll.u32 %s5485_s23, 9  ;;  %s5495_s27 = sld [smem:[#allocation50_spill]] }
 0x1d4   : > { %s5494_s18 = scalar_select %p4971_p10, 1, 0 }
 0x1d5   : > { %s669_s21 = scalar_lea.vmem [#allocation2], %s2968_s0  ;;  %p4986_p11 = pnand %p3475_p9, %p4952_p0 }
 0x1d6   : > { %s677_s1 = sshll.u32 %s669_s21, 4  ;;  %s2972_s5 = sshll.u32 %s4965_s17, 1  ;;  %s4982_s1 = int_to_ptr.vmem [resolvable:$true] %s677_s1 }
 0x1d7   : > { %s666_s29 = scalar_lea.sflag [#allocation3], %s4965_s17  ;;  %p4232_p8 = pneg %p4986_p11 }
 0x1d9   : > { %s5496_s19 = smov %s5495_s27  ;;  %s4980_s2 = scalar_lea.hbm %s5495_s27, %s3129_s22 }
 0x1da   : > { %s4230_s22 = scalar_lea.hbm %s4980_s2, 512  ;;  %s4235_s25 = scalar_lea.hbm %s5496_s19, 1024 }
 0x1db   : > { %p4231_p12 = scmp.ne.s32.totalorder %s4980_s2, %s4230_s22  ;;  %p4236_p13 = scmp.lt.u32.totalorder %s4980_s2, %s5496_s19 }
 0x1dc   : > { %p4237_p0 = scmp.lt.u32.totalorder %s4235_s25, %s4230_s22  ;;  %p4239_p5 = scmp.lt.u32.totalorder %s4230_s22, %s4980_s2 }
 0x1dd   : > { %p4233_p1 = pnand %p4232_p8, %p4231_p12 }
 0x1de   : > { %p4238_p2 = por %p4237_p0, %p4236_p13 }
 0x1df   : > { %p4234_p3 = pneg %p4233_p1 }
 0x1e0   : > { %p4240_p7 = por %p4239_p5, %p4238_p2 }
 0x1e2   : > { %p4241_p9 = pnand %p4240_p7, %p4234_p3 }
 0x1e4   : > { %4244 = shalt.err (!%p4241_p9)
}
 0x1e5   : > { %s4245_s4 = scalar_lea.vmem %s4982_s1, 512  ;;  %s4422_s0 = smov [#allocation2]  }
 0x1e6   : > { %p4246_p12 = scmp.ne.s32.totalorder %s4982_s1, %s4245_s4  ;;  %s4250_s20 = sshll.u32 %s4422_s0, 4  ;;  %s4251_s20 = int_to_ptr.vmem [resolvable:$false] %s4250_s20 }
 0x1e7   : > { %s4252_s27 = scalar_lea.vmem %s4251_s20, 1024  ;;  %p4253_p4 = scmp.lt.s32.totalorder %s4982_s1, %s4251_s20 }
 0x1e8   : > { %p4248_p1 = pnand %p4246_p12, %p4232_p8  ;;  %p4254_p13 = scmp.lt.s32.totalorder %s4252_s27, %s4245_s4 }
 0x1ea   : > { %p4249_p10 = pneg %p4248_p1  ;;  %p4255_p0 = por %p4254_p13, %p4253_p4 }
 0x1ec   : > { %p4256_p2 = pnand %p4255_p0, %p4249_p10 }
 0x1ee   : > { %4259 = shalt.err (!%p4256_p2)
}
 0x1ef   : > { %s5498_s22 = smov 8   ;;  %s5499_s25 = smov 128  }
 0x1f0   : > { %3451 = dma.hbm_to_vmem [thread:$0]  (!%p4986_p11), %s4980_s2, 512, %s4982_s1, %s666_s29, %s5499_s25, %s5499_s25, %s5498_s22  }
 0x1f1   : > { %s2973_s21 = sshll.u32 %s5485_s23, 5  ;;  %s5500_s20 = sld [smem:[#allocation51_spill]] }
 0x1f2   : > { %s691_s6 = scalar_lea.vmem [#allocation5], %s2972_s5  ;;  %s5501_s8 = sand.u32 1, %s5485_s23  }
 0x1f3   : > { %s698_s7 = sshll.u32 %s691_s6, 4  ;;  %s688_s9 = scalar_lea.sflag [#allocation6], %s5501_s8  ;;  %s699_s7 = int_to_ptr.vmem [resolvable:$true] %s698_s7 }
 0x1f7   : > { %s5027_s27 = scalar_lea.hbm %s5500_s20, %s2973_s21  ;;  %s4265_s29 = scalar_lea.hbm %s5500_s20, 64 }
 0x1f8   : > { %s4260_s10 = scalar_lea.hbm %s5027_s27, 32  ;;  %p4266_p5 = scmp.lt.u32.totalorder %s5027_s27, %s5500_s20 }
 0x1f9   : > { %p4261_p4 = scmp.ne.s32.totalorder %s5027_s27, %s4260_s10  ;;  %p4267_p7 = scmp.lt.u32.totalorder %s4265_s29, %s4260_s10 }
 0x1fa   : > { %p4269_p12 = scmp.lt.u32.totalorder %s4260_s10, %s5027_s27 }
 0x1fb   : > { %p4263_p10 = pnand %p4261_p4, %p4232_p8  ;;  %p4268_p9 = por %p4267_p7, %p4266_p5 }
 0x1fd   : > { %p4264_p3 = pneg %p4263_p10  ;;  %p4270_p1 = por %p4269_p12, %p4268_p9 }
 0x1ff   : > { %p4271_p13 = pnand %p4270_p1, %p4264_p3 }
 0x201   : > { %4274 = shalt.err (!%p4271_p13)
}
 0x202   : > { %s4275_s5 = scalar_lea.vmem %s699_s7, 32  ;;  %s4423_s6 = smov [#allocation5]  }
 0x203   : > { %p4276_p0 = scmp.ne.s32.totalorder %s699_s7, %s4275_s5  ;;  %s4280_s8 = sshll.u32 %s4423_s6, 4  ;;  %s4281_s8 = int_to_ptr.vmem [resolvable:$false] %s4280_s8 }
 0x204   : > { %s4282_s23 = scalar_lea.vmem %s4281_s8, 64  ;;  %p4283_p10 = scmp.lt.s32.totalorder %s699_s7, %s4281_s8 }
 0x205   : > { %p4278_p2 = pnand %p4276_p0, %p4232_p8  ;;  %p4284_p6 = scmp.lt.s32.totalorder %s4282_s23, %s4275_s5 }
 0x207   : > { %p4279_p4 = pneg %p4278_p2  ;;  %p4285_p5 = por %p4284_p6, %p4283_p10 }
 0x209   : > { %p4286_p7 = pnand %p4285_p5, %p4279_p4 }
 0x20b   : > { %4289 = shalt.err (!%p4286_p7)
}
 0x20c   : > { %3454 = dma.hbm_to_vmem [thread:$0]  (!%p4986_p11), %s5027_s27, 32, %s699_s7, %s688_s9  }
 0x20d   : > { %s5502_s10 = sld [smem:[#allocation49_spill]] }
 0x213   : > { %p5503_p3 = scmp.ne.s32.totalorder %s5502_s10, 0 }
 0x214   : > { %s5504_s25 = sld [smem:[#allocation45_spill]] (!%p5503_p3)  ;;  %p5505_p6 = scmp.ne.s32.totalorder (!%p5503_p3), %s5492_s28, 0 }
 0x215   : > { %707 = sbr.rel (%p5503_p3) target bundleno = 3832 (0xef8), region = 92 }
 0x21a   : > { %s5055_s21 = sand.u32 (!%p5503_p3), 1, %s5504_s25  }
 0x21b   : > { %s2975_s0 = sshll.u32 (!%p5503_p3), %s5055_s21, 5  ;;  %s710_s4 = scalar_lea.sflag (!%p5503_p3), [#allocation3], %s5055_s21 }
 0x21c   : > { %s5059_s1 = scalar_lea.vmem [#allocation2], %s2975_s0 }
 0x21d   : > { %4335 = dma.done.wait (%p5505_p6), %s710_s4, 512  }
 0x21e   : > { %4337 = vsyncadd (%p5505_p6), %s710_s4, 4294966784  ;;  %s5506_s3 = sld [smem:[#allocation48_spill]]  ;;  %s2976_s9 = sshll.u32 %s5055_s21, 1 }
 0x21f   : > { %s5067_s2 = scalar_lea.vmem [#allocation5], %s2976_s9 }
 0x224   : > { %s718_s7 = sand.u32 1, %s5506_s3  }
 0x225   : > { %s719_s27 = scalar_lea.sflag [#allocation6], %s718_s7 }
 0x226   : > { %4339 = dma.done.wait (%p5505_p6), %s719_s27, 32  }
 0x227   : > { %4341 = vsyncadd (%p5505_p6), %s719_s27, 4294967264  ;;  %p5507_p11 = scmp.eq.s32.totalorder %s5506_s3, 0 }
 0x229   : > { %4343 = dma.done.wait (%p5507_p11), [#allocation6], 256   ;;  %p5508_p8 = pmov %p5507_p11 }
 0x22b   : > { %4345 = vsyncadd (%p5508_p8), [#allocation6], 4294967040  ;;  %p5509_p9 = pmov %p5508_p8 }
 0x22c   : > { %p5510_p12 = pmov %p5508_p8 }
 0x22d   : > { %4347 = dma.done.wait (%p5509_p9), [#allocation9], 32  }
 0x22e   : > { %4349 = vsyncadd (%p5510_p12), [#allocation9], 4294967264  ;;  %p5511_p1 = pmov %p5508_p8 }
 0x230   : > { %4351 = dma.done.wait (%p5511_p1), [#allocation12], 3120   ;;  %p5512_p13 = pmov %p5511_p1 }
 0x231   : > { %p5513_p0 = pmov %p5511_p1 }
 0x232   : > { %4353 = vsyncadd (%p5512_p13), [#allocation12], 4294964176 }
 0x233   : > { %4355 = dma.done.wait (%p5513_p0), [#allocation15], 1040   ;;  %p5514_p2 = pmov %p5513_p0 }
 0x234   : > { %p5515_p4 = pmov %p5513_p0 }
 0x235   : > { %4357 = vsyncadd (%p5514_p2), [#allocation15], 4294966256 }
 0x236   : > { %4359 = dma.done.wait (%p5515_p4), [#allocation18], 32   ;;  %p5516_p10 = pmov %p5513_p0 }
 0x237   : > { %p5517_p5 = pmov %p5513_p0 }
 0x238   : > { %4361 = vsyncadd (%p5516_p10), [#allocation18], 4294967264 }
 0x239   : > { %4363 = dma.done.wait (%p5517_p5), [#allocation21], 4160   ;;  %p5518_p7 = pmov %p5513_p0 }
 0x23a   : > { %p5519_p3 = pmov %p5513_p0 }
 0x23b   : > { %4365 = vsyncadd (%p5518_p7), [#allocation21], 4294963136 }
 0x23c   : > { %4367 = dma.done.wait (%p5519_p3), [#allocation24], 4112   ;;  %p5520_p6 = pmov %p5513_p0 }
 0x23d   : > { %p5521_p11 = pmov %p5513_p0 }
 0x23e   : > { %4369 = vsyncadd (%p5520_p6), [#allocation24], 4294963184 }
 0x23f   : > { %4371 = dma.done.wait (%p5521_p11), [#allocation27], 32   ;;  %p5522_p8 = pmov %p5513_p0 }
 0x240   : > { %p5523_p9 = pmov %p5513_p0 }
 0x241   : > { %4373 = vsyncadd (%p5522_p8), [#allocation27], 4294967264 }
 0x242   : > { %4375 = dma.done.wait (%p5523_p9), [#allocation30], 1024   ;;  %p5524_p12 = pmov %p5513_p0 }
 0x243   : > { %v845_v0 = vld [vmem:[%s5059_s1] sm:$0xff]  ;;  %v847_v2 = vld [vmem:[%s5059_s1 + $0x10] sm:$0xff]  ;;  %v846_v5 = vld [vmem:[%s5059_s1 + $0x8] sm:$0xff]  ;;  %v4424_v45 = vmov 0   ;;  %vm4426_vm0 = vmmov 0   ;;  %vm1308_vm2 = vcmask 130048  }
 0x244   : > { %4377 = vsyncadd (%p5524_p12), [#allocation30], 4294966272  ;;  %v849_v1 = vld [vmem:[#allocation7] sm:$0xff]  ;;  %v850_v6 = vld [vmem:[#allocation7 + $0x8] sm:$0xff]  ;;  %1133 = vmatprep.mubr.bf16.mxu0 %v4424_v45  ;;  %3553 = vset.pattern.permute.xlu0 %v4424_v45  ;;  %vm2477_vm5 = vcmask 261120   ;;  %vm2553_vm6 = vcmask 1041408  }
 0x245   : > { %v5111_v3 = vadd.f32 %v849_v1, %v845_v0  ;;  %v5113_v4 = vadd.f32 %v849_v1, %v847_v2  ;;  %v848_v7 = vld [vmem:[%s5059_s1 + $0x18] sm:$0xff]  ;;  %v5119_v8 = vadd.f32 %v850_v6, %v846_v5  ;;  %v3557_v12 = vld [vmem:[#allocation11 + $0x1c] ss:$12 sps:$4 sm:$0xff]   ;;  %v3565_v34 = vld [vmem:[#allocation11 + $0x4c] ss:$12 sps:$4 sm:$0xff]   ;;  %s3125_s28 = sshll.u32 %s5506_s3, 4 }
 0x246   : > { %v5121_v9 = vadd.f32 %v850_v6, %v848_v7  ;;  %v3554_v10 = vld [vmem:[#allocation11 + $0x4] ss:$12 sps:$4 sm:$0xff]   ;;  %v3556_v11 = vld [vmem:[#allocation11] ss:$12 sps:$4 sm:$0xff]   ;;  %v3559_v13 = vld [vmem:[#allocation11 + $0x8] ss:$12 sps:$4 sm:$0xff]  }
 0x247   : > { %857 = vadd.xlane.f32.xlu0 %v5111_v3  ;;  %861 = vadd.xlane.f32.xlu1 %v5113_v4  ;;  %v3560_v30 = vld [vmem:[#allocation11 + $0x18] ss:$12 sps:$4 sm:$0xff]   ;;  %v3561_v31 = vld [vmem:[#allocation11 + $0x34] ss:$12 sps:$4 sm:$0xff]   ;;  %v3564_v33 = vld [vmem:[#allocation11 + $0x30] ss:$12 sps:$4 sm:$0xff]  }
 0x248   : > { %1101 = vmatprep.subr.bf16.mxu0 %v3554_v10  ;;  %3228 = vmatprep.subr.bf16.mxu1 %v3559_v13  ;;  %v3563_v32 = vld [vmem:[#allocation11 + $0x20] ss:$12 sps:$4 sm:$0xff]   ;;  %v3567_v35 = vld [vmem:[#allocation11 + $0x38] ss:$12 sps:$4 sm:$0xff]   ;;  %v3568_v36 = vld [vmem:[#allocation11 + $0x48] ss:$12 sps:$4 sm:$0xff]  }
 0x249   : > { %1102 = vmatpush1.bf16.msra.mxu0 %v3556_v11  ;;  %3229 = vmatpush3.bf16.msra.mxu1 %v3559_v13  ;;  %v3569_v37 = vld [vmem:[#allocation11 + $0x64] ss:$12 sps:$4 sm:$0xff]   ;;  %v3572_v39 = vld [vmem:[#allocation11 + $0x60] ss:$12 sps:$4 sm:$0xff]   ;;  %v3573_v40 = vld [vmem:[#allocation11 + $0x7c] ss:$12 sps:$4 sm:$0xff]  }
 0x24a   : > { %1103 = vmatprep.subr.bf16.mxu0 %v3557_v12  ;;  %3230 = vmatprep.subr.bf16.mxu1 %v3563_v32  ;;  %v3571_v38 = vld [vmem:[#allocation11 + $0x50] ss:$12 sps:$4 sm:$0xff]   ;;  %v3575_v41 = vld [vmem:[#allocation11 + $0x68] ss:$12 sps:$4 sm:$0xff]   ;;  %v3576_v42 = vld [vmem:[#allocation11 + $0x78] ss:$12 sps:$4 sm:$0xff]  }
 0x24b   : > { %859 = vadd.xlane.f32.xlu0 %v5119_v8  ;;  %863 = vadd.xlane.f32.xlu1 %v5121_v9  ;;  %v3577_v43 = vld [vmem:[#allocation11 + $0x94] ss:$12 sps:$4 sm:$0xff]   ;;  %v3580_v46 = vld [vmem:[#allocation11 + $0x90] ss:$12 sps:$4 sm:$0xff]   ;;  %v3581_v47 = vld [vmem:[#allocation11 + $0xac] ss:$12 sps:$4 sm:$0xff]  }
 0x24c   : > { %v3579_v44 = vld [vmem:[#allocation11 + $0x80] ss:$12 sps:$4 sm:$0xff]   ;;  %v3583_v48 = vld [vmem:[#allocation11 + $0x98] ss:$12 sps:$4 sm:$0xff]   ;;  %v3584_v49 = vld [vmem:[#allocation11 + $0xa8] ss:$12 sps:$4 sm:$0xff]  }
 0x24d   : > { %1104 = vmatpush1.bf16.msra.mxu0 %v3560_v30  ;;  %3231 = vmatpush3.bf16.msra.mxu1 %v3563_v32  ;;  %v3585_v50 = vld [vmem:[#allocation11 + $0xb0] ss:$12 sps:$4 sm:$0xff]   ;;  %s842_s29 = scalar_lea.vmem [#allocation31], %s5055_s21  ;;  %s5525_s6 = sld [smem:[#allocation62_spill]] }
 0x24e   : > { %1105 = vmatprep.subr.bf16.mxu0 %v3561_v31  ;;  %3232 = vmatprep.subr.bf16.mxu1 %v3567_v35  ;;  %v2993_v1 = vld [vmem:[#allocation8] ss:$0 sm:$0xff]  ;;  %v2994_v10 = vld [vmem:[#allocation10] ss:$0 sm:$0xff]  ;;  %s2708_s17 = sshll.u32 %s842_s29, 4  ;;  %s2696_s23 = scalar_lea.sflag [#allocation4], %s5055_s21  ;;  %s5364_s17 = int_to_ptr.vmem [resolvable:$true] %s2708_s17 }
 0x24f   : > { %s4290_s10 = scalar_lea.vmem %s5364_s17, 16  ;;  %p5526_p13 = scmp.ne.s32.totalorder %s5493_s26, 0 }
 0x250   : > { %p4291_p1 = scmp.ne.s32.totalorder %s5364_s17, %s4290_s10  ;;  %s4428_s25 = smov [#allocation31]  }
 0x251   : > { %1106 = vmatpush1.bf16.msra.mxu0 %v3564_v33  ;;  %3233 = vmatpush3.bf16.msra.mxu1 %v3567_v35  ;;  %s4294_s0 = sshll.u32 %s4428_s25, 4  ;;  %s4295_s0 = int_to_ptr.vmem [resolvable:$false] %s4294_s0 }
 0x252   : > { %1107 = vmatprep.subr.bf16.mxu0 %v3565_v34  ;;  %3234 = vmatprep.subr.bf16.mxu1 %v3571_v38  ;;  %p4292_p0 = pnand %p4291_p1, %p5526_p13  ;;  %s4296_s4 = scalar_lea.vmem %s4295_s0, 32 }
 0x253   : > { %s5362_s8 = scalar_lea.hbm %s5525_s6, %s3125_s28  ;;  %p4297_p4 = scmp.lt.s32.totalorder %s5364_s17, %s4295_s0 }
 0x254   : > { %p4293_p2 = pneg %p4292_p0  ;;  %p4298_p10 = scmp.lt.s32.totalorder %s4296_s4, %s4290_s10 }
 0x255   : > { %1108 = vmatpush1.bf16.msra.mxu0 %v3568_v36  ;;  %3235 = vmatpush3.bf16.msra.mxu1 %v3571_v38 }
 0x256   : > { %1109 = vmatprep.subr.bf16.mxu0 %v3569_v37  ;;  %3236 = vmatprep.subr.bf16.mxu1 %v3575_v41  ;;  %p4299_p5 = por %p4298_p10, %p4297_p4 }
 0x258   : > { %p4300_p7 = pnand %p4299_p5, %p4293_p2 }
 0x259   : > { %1110 = vmatpush1.bf16.msra.mxu0 %v3572_v39  ;;  %3237 = vmatpush3.bf16.msra.mxu1 %v3575_v41 }
 0x25a   : > { %1111 = vmatprep.subr.bf16.mxu0 %v3573_v40  ;;  %3238 = vmatprep.subr.bf16.mxu1 %v3579_v44 }
 0x25d   : > { %1112 = vmatpush1.bf16.msra.mxu0 %v3576_v42  ;;  %3239 = vmatpush3.bf16.msra.mxu1 %v3579_v44 }
 0x25e   : > { %1113 = vmatprep.subr.bf16.mxu0 %v3577_v43  ;;  %3240 = vmatprep.subr.bf16.mxu1 %v3583_v48 }
 0x261   : > { %1114 = vmatpush1.bf16.msra.mxu0 %v3580_v46  ;;  %3241 = vmatpush3.bf16.msra.mxu1 %v3583_v48 }
 0x262   : > { %1115 = vmatprep.subr.bf16.mxu0 %v3581_v47  ;;  %3242 = vmatprep.subr.bf16.mxu1 %v3585_v50 }
 0x265   : > { %1116 = vmatpush1.bf16.msra.mxu0 %v3584_v49  ;;  %3243 = vmatpush3.bf16.msra.mxu1 %v3585_v50 }
 0x2d4   : > { %v858_v14 = vpop.xlane.xlu0 %857  ;;  %v862_v15 = vpop.xlane.xlu1 %861 }
 0x2d5   : > { %v866_v16 = vmul.f32 0.0078125, %v858_v14  ;;  %v868_v17 = vmul.f32 0.0078125, %v862_v15 }
 0x2d7   : > { %v5126_v18 = vsub.f32 %v5111_v3, %v866_v16  ;;  %v5129_v19 = vsub.f32 %v5113_v4, %v868_v17 }
 0x2d8   : > { %v860_v20 = vpop.xlane.xlu0 %859  ;;  %v864_v21 = vpop.xlane.xlu1 %863 }
 0x2d9   : > { %v867_v22 = vmul.f32 0.0078125, %v860_v20  ;;  %v874_v23 = vmul.f32 %v5126_v18, %v5126_v18  ;;  %v869_v24 = vmul.f32 0.0078125, %v864_v21  ;;  %v876_v27 = vmul.f32 %v5129_v19, %v5129_v19 }
 0x2db   : > { %v5134_v25 = vsub.f32 %v5119_v8, %v867_v22  ;;  %878 = vadd.xlane.f32.xlu0 %v874_v23  ;;  %v5137_v26 = vsub.f32 %v5121_v9, %v869_v24  ;;  %v4425_v24 = vmov 0.0  }
 0x2dc   : > { %3248 = vmatprep.subr.bf16.mxu1 %v4425_v24  ;;  %3254 = vmatprep.subr.bf16.mxu0 %v4425_v24 }
 0x2dd   : > { %v875_v28 = vmul.f32 %v5134_v25, %v5134_v25  ;;  %v877_v29 = vmul.f32 %v5137_v26, %v5137_v26 }
 0x2df   : > { %882 = vadd.xlane.f32.xlu0 %v876_v27  ;;  %880 = vadd.xlane.f32.xlu1 %v875_v28  ;;  %v956_v27 = vld [vmem:[#allocation13] sm:$0x7] }
 0x2e3   : > { %884 = vadd.xlane.f32.xlu1 %v877_v29 }
 0x368   : > { %v879_v51 = vpop.xlane.xlu0 %878 }
 0x369   : > { %v886_v52 = vmul.f32 0.0078125, %v879_v51 }
 0x36b   : > { %v890_v53 = vadd.f32 1e-05, %v886_v52 }
 0x36c   : > { %v881_v54 = vpop.xlane.xlu1 %880  ;;  %v883_v55 = vpop.xlane.xlu0 %882 }
 0x36d   : > { %3682 = vrsqrt.f32 %v890_v53  ;;  %v887_v56 = vmul.f32 0.0078125, %v881_v54  ;;  %v888_v57 = vmul.f32 0.0078125, %v883_v55 }
 0x36f   : > { %v891_v58 = vadd.f32 1e-05, %v887_v56  ;;  %v892_v59 = vadd.f32 1e-05, %v888_v57 }
 0x370   : > { %v885_v60 = vpop.xlane.xlu1 %884 }
 0x371   : > { %3684 = vrsqrt.f32 %v891_v58  ;;  %v889_v61 = vmul.f32 0.0078125, %v885_v60 }
 0x372   : > { %3686 = vrsqrt.f32 %v892_v59 }
 0x373   : > { %v893_v62 = vadd.f32 1e-05, %v889_v61 }
 0x375   : > { %3688 = vrsqrt.f32 %v893_v62 }
 0x377   : > { %v3683_v63 = vpop.eup %3682 }
 0x378   : > { %v898_v0 = vmul.f32 %v3683_v63, %v5126_v18 }
 0x37a   : > { %v908_v7 = vmul.f32 %v2993_v1, %v898_v0 }
 0x37b   : > { %v3685_v2 = vpop.eup %3684 }
 0x37c   : > { %v3687_v5 = vpop.eup %3686  ;;  %v899_v6 = vmul.f32 %v3685_v2, %v5134_v25  ;;  %v918_v14 = vadd.f32 %v2994_v10, %v908_v7 }
 0x37d   : > { %v900_v11 = vmul.f32 %v3687_v5, %v5129_v19  ;;  %v958_v19 = vlaneseq }
 0x37e   : > { %v909_v12 = vmul.f32 %v2993_v1, %v899_v6 }
 0x37f   : > { %v3689_v13 = vpop.eup %3688  ;;  %v910_v17 = vmul.f32 %v2993_v1, %v900_v11  ;;  %v5158_v25 = vshrl.u32 %v958_v19, 7  ;;  %v5175_v0 = vand.u32 127, %v958_v19 }
 0x380   : > { %v919_v15 = vadd.f32 %v2994_v10, %v909_v12  ;;  %v901_v16 = vmul.f32 %v3689_v13, %v5137_v26 }
 0x381   : > { %v920_v18 = vadd.f32 %v2994_v10, %v910_v17  ;;  %v960_v26 = vsub.s32 0, %v5158_v25  ;;  %v964_v28 = vsub.s32 1, %v5158_v25  ;;  %v968_v30 = vsub.s32 2, %v5158_v25 }
 0x382   : > { %v922_v20 = vpack.c.bf16 %v919_v15, %v918_v14  ;;  %v911_v21 = vmul.f32 %v2993_v1, %v901_v16  ;;  %v1295_v1 = vadd.s32 8, %v5158_v25  ;;  %vm1298_vm1 = vcmp.le.s32.totalorder %v5175_v0, %v5158_v25 }
 0x383   : > { %v961_v29 = vrot.slane %v956_v27, %v960_v26  ;;  %v965_v32 = vrot.slane %v956_v27, %v964_v28  ;;  %v969_v38 = vrot.slane %v956_v27, %v968_v30 }
 0x384   : > { %1134 = vmatmul.mubr.bf16.vlgmr.msra.gmra.mrb[0].mxu0 %v922_v20  ;;  %3244 = vmatprep.mubr.bf16.mxu1 %v922_v20  ;;  %v921_v22 = vadd.f32 %v2994_v10, %v911_v21  ;;  %vm1299_vm3 = vcmp.le.s32.totalorder %v5175_v0, %v1295_v1  ;;  %v3588_v1 = vld [vmem:[#allocation14 + $0x10] sm:$0xff]  }
 0x385   : > { %1143 = vmatprep.mubr.bf16.mxu0 %v4424_v45 }
 0x386   : > { %v923_v23 = vpack.c.bf16 %v921_v22, %v920_v18 }
 0x388   : > { %3245 = vmatmul.mubr.bf16.vlgmr.msra.gmra.mrb[0].mxu1 %v923_v23 }
 0x389   : > { %3250 = vmatprep.mubr.msk.bf16.mxu1 %vm4426_vm0, %v4425_v24 }
 0x38c   : > { %1144 = vmatmul.mubr.bf16.gmra.mrb[4].mxu0 %v923_v23 }
 0x38d   : > { %3256 = vmatprep.mubr.msk.bf16.mxu0 %vm4426_vm0, %v4425_v24 }
 0x457   : > { %v1135_v31 = vpop.f32.mrb[0].mxu0 }
 0x458   : > { %v1137_v33 = vpop.f32.mrb[1].mxu0  ;;  %v1136_v35 = vadd.f32 %v1135_v31, %v961_v29 }
 0x459   : > { %v1139_v34 = vpop.f32.mrb[2].mxu0  ;;  %v1138_v39 = vadd.f32 %v1137_v33, %v965_v32 }
 0x45a   : > { %v1140_v36 = vadd.f32 %v1139_v34, %v961_v29  ;;  %v1141_v37 = vpop.f32.mrb[3].mxu0 }
 0x45b   : > { %v1142_v40 = vadd.f32 %v1141_v37, %v965_v32  ;;  %v3246_v41 = vpop.f32.mrb[0].mxu1 }
 0x45c   : > { %v1203_v42 = vpack.c.bf16 %v1140_v36, %v1136_v35  ;;  %v1188_v43 = vpop.f32.mrb[1].mxu1  ;;  %v1197_v47 = vadd.f32 %v3246_v41, %v969_v38 }
 0x45d   : > { %v1205_v44 = vpack.c.bf16 %v1142_v40, %v1138_v39  ;;  %v3247_v46 = vpop.f32.mrb[2].mxu1  ;;  %v1189_v50 = vadd.f32 %v1188_v43, %v969_v38 }
 0x45e   : > { %v1200_v48 = vadd.f32 %v3247_v46, %v969_v38  ;;  %v1191_v49 = vpop.f32.mrb[3].mxu1 }
 0x45f   : > { %v1192_v51 = vadd.f32 %v1191_v49, %v969_v38  ;;  %v1145_v52 = vpop.f32.mrb[4].mxu0  ;;  %3249 = vmatpush3.bf16.xpose.msra.mxu1 %v1205_v44 }
 0x460   : > { %v1356_v53 = vpack.c.bf16 %v1200_v48, %v1197_v47  ;;  %v1147_v54 = vpop.f32.mrb[5].mxu0  ;;  %3260 = vmatprep.subr.bf16.mxu1 %v4425_v24  ;;  %v1146_v57 = vadd.f32 %v1145_v52, %v961_v29  ;;  %v3586_v52 = vld [vmem:[#allocation14] sm:$0xff]  }
 0x461   : > { %v1355_v55 = vpack.c.bf16 %v1192_v51, %v1189_v50  ;;  %v1149_v56 = vpop.f32.mrb[6].mxu0  ;;  %v1148_v60 = vadd.f32 %v1147_v54, %v965_v32 }
 0x462   : > { %v1150_v58 = vadd.f32 %v1149_v56, %v961_v29  ;;  %v1151_v59 = vpop.f32.mrb[7].mxu0 }
 0x463   : > { %v1152_v61 = vadd.f32 %v1151_v59, %v965_v32 }
 0x464   : > { %v1204_v62 = vpack.c.bf16 %v1150_v58, %v1146_v57 }
 0x465   : > { %v1206_v63 = vpack.c.bf16 %v1152_v61, %v1148_v60 }
 0x466   : > { %3251 = vmatmul.mubr.bf16.vlgmr.msra.gmra.mrb[4].mxu1 %v1203_v42 }
 0x467   : > { %3255 = vmatpush3.bf16.xpose.msra.mxu0 %v1206_v63  ;;  %3261 = vmatpush3.bf16.msra.mxu1 %v1355_v55 }
 0x468   : > { %3266 = vmatprep.subr.bf16.mxu0 %v4425_v24  ;;  %3262 = vmatprep.mubr.msk.bf16.mxu1 %vm4426_vm0, %v4425_v24 }
 0x469   : > { %3272 = vmatprep.subr.bf16.mxu1 %v3586_v52 }
 0x46e   : > { %3257 = vmatmul.mubr.bf16.vlgmr.msra.gmra.mrb[8].mxu0 %v1204_v62  ;;  %v3587_v62 = vld [vmem:[#allocation14 + $0x8] sm:$0xff]  }
 0x46f   : > { %3267 = vmatpush3.bf16.msra.mxu0 %v1356_v53  ;;  %3268 = vmatprep.mubr.msk.bf16.mxu0 %vm4426_vm0, %v4425_v24 }
 0x539   : > { %v1241_v2 = vpop.f32.mrb[4].mxu1 }
 0x53a   : > { %v1289_v5 = vmul.f32 0.088388346, %v1241_v2  ;;  %v3252_v6 = vpop.f32.mrb[5].mxu1 }
 0x53b   : > { %v1244_v7 = vpop.f32.mrb[6].mxu1 }
 0x53c   : > { %v1290_v10 = vmul.f32 0.088388346, %v1244_v7  ;;  %v3253_v11 = vpop.f32.mrb[7].mxu1  ;;  %v1304_v12 = vsel %vm1298_vm1, %v1289_v5, -1e+30 }
 0x53d   : > { %v1309_v13 = vsel %vm1308_vm2, %v1304_v12, -inf  ;;  %v3590_v11 = vld [vmem:[#allocation14 + $0x20] sm:$0xff]  }
 0x53e   : > { %1310 = vmax.xlane.f32.xlu0 %v1309_v13  ;;  %v1305_v14 = vsel %vm1299_vm3, %v1290_v10, -1e+30  ;;  %v3589_v10 = vld [vmem:[#allocation14 + $0x18] sm:$0xff]   ;;  %v3592_v13 = vld [vmem:[#allocation14 + $0x30] sm:$0xff]  }
 0x53f   : > { %v1312_v15 = vsel %vm1308_vm2, %v1305_v14, -inf }
 0x540   : > { %1313 = vmax.xlane.f32.xlu1 %v1312_v15 }
 0x541   : > { %v1282_v16 = vpop.f32.mrb[8].mxu0 }
 0x542   : > { %v1291_v17 = vmul.f32 0.088388346, %v1282_v16  ;;  %v3258_v20 = vpop.f32.mrb[9].mxu0 }
 0x543   : > { %v1285_v21 = vpop.f32.mrb[10].mxu0 }
 0x544   : > { %v1292_v18 = vmul.f32 0.088388346, %v1285_v21  ;;  %v3259_v22 = vpop.f32.mrb[11].mxu0  ;;  %v1306_v23 = vsel %vm1298_vm1, %v1291_v17, -1e+30 }
 0x545   : > { %v1315_v19 = vsel %vm1308_vm2, %v1306_v23, -inf }
 0x546   : > { %1316 = vmax.xlane.f32.xlu0 %v1315_v19  ;;  %v1307_v27 = vsel %vm1299_vm3, %v1292_v18, -1e+30 }
 0x547   : > { %v1318_v29 = vsel %vm1308_vm2, %v1307_v27, -inf }
 0x548   : > { %1319 = vmax.xlane.f32.xlu1 %v1318_v29 }
 0x5cb   : > { %v1311_v31 = vpop.xlane.xlu0 %1310 }
 0x5cc   : > { %v1321_v32 = vsub.f32 %v1304_v12, %v1311_v31  ;;  %v3591_v12 = vld [vmem:[#allocation14 + $0x28] sm:$0xff]   ;;  %v3029_v31 = vld [vmem:[#allocation16] ss:$0 sm:$0xff] }
 0x5cd   : > { %v1314_v33 = vpop.xlane.xlu1 %1313 }
 0x5ce   : > { %v1325_v34 = vmul.f32 1.442695, %v1321_v32  ;;  %v1322_v35 = vsub.f32 %v1305_v14, %v1314_v33  ;;  %v3593_v14 = vld [vmem:[#allocation14 + $0x38] sm:$0xff]  }
 0x5d0   : > { %3690 = vpow2.f32 %v1325_v34  ;;  %v1327_v36 = vmul.f32 1.442695, %v1322_v35 }
 0x5d2   : > { %3692 = vpow2.f32 %v1327_v36 }
 0x5d3   : > { %v1317_v37 = vpop.xlane.xlu0 %1316 }
 0x5d4   : > { %v1323_v38 = vsub.f32 %v1306_v23, %v1317_v37 }
 0x5d5   : > { %v1320_v39 = vpop.xlane.xlu1 %1319 }
 0x5d6   : > { %v1329_v40 = vmul.f32 1.442695, %v1323_v38  ;;  %v1324_v41 = vsub.f32 %v1307_v27, %v1320_v39 }
 0x5d8   : > { %3694 = vpow2.f32 %v1329_v40  ;;  %v1331_v42 = vmul.f32 1.442695, %v1324_v41 }
 0x5da   : > { %v3691_v43 = vpop.eup %3690  ;;  %3696 = vpow2.f32 %v1331_v42 }
 0x5db   : > { %v1333_v44 = vsel %vm1308_vm2, %v3691_v43, 0.0 }
 0x5dc   : > { %v3693_v46 = vpop.eup %3692  ;;  %1334 = vadd.xlane.f32.xlu0 %v1333_v44  ;;  %v3602_v44 = vld [vmem:[#allocation20 + $0x24] ss:$16 sps:$4 sm:$0xff]  }
 0x5dd   : > { %v1336_v47 = vsel %vm1308_vm2, %v3693_v46, 0.0 }
 0x5de   : > { %1337 = vadd.xlane.f32.xlu1 %v1336_v47  ;;  %v3603_v47 = vld [vmem:[#allocation20 + $0x28] ss:$16 sps:$4 sm:$0xff]  }
 0x5e2   : > { %v3695_v48 = vpop.eup %3694 }
 0x5e3   : > { %v1339_v49 = vsel %vm1308_vm2, %v3695_v48, 0.0 }
 0x5e4   : > { %v3697_v50 = vpop.eup %3696  ;;  %1340 = vadd.xlane.f32.xlu0 %v1339_v49 }
 0x5e5   : > { %v1342_v51 = vsel %vm1308_vm2, %v3697_v50, 0.0 }
 0x5e6   : > { %1343 = vadd.xlane.f32.xlu1 %v1342_v51 }
 0x669   : > { %v1335_v53 = vpop.xlane.xlu0 %1334 }
 0x66a   : > { %3698 = vrcp.f32 %v1335_v53 }
 0x66b   : > { %v1338_v54 = vpop.xlane.xlu1 %1337 }
 0x66c   : > { %3700 = vrcp.f32 %v1338_v54 }
 0x671   : > { %v1341_v55 = vpop.xlane.xlu0 %1340 }
 0x672   : > { %3702 = vrcp.f32 %v1341_v55 }
 0x673   : > { %v1344_v56 = vpop.xlane.xlu1 %1343 }
 0x674   : > { %v3699_v57 = vpop.eup %3698  ;;  %3704 = vrcp.f32 %v1344_v56 }
 0x675   : > { %v1349_v59 = vmul.f32 %v3699_v57, %v3691_v43  ;;  %v3597_v43 = vld [vmem:[#allocation20 + $0x8] ss:$16 sps:$4 sm:$0xff]  }
 0x676   : > { %v3701_v58 = vpop.eup %3700 }
 0x677   : > { %v1350_v60 = vmul.f32 %v3701_v58, %v3693_v46  ;;  %v3600_v46 = vld [vmem:[#allocation20 + $0x20] ss:$16 sps:$4 sm:$0xff]  }
 0x679   : > { %v1353_v61 = vpack.c.bf16 %v1350_v60, %v1349_v59 }
 0x67b   : > { %3263 = vmatmul.mubr.msk.bf16.vlgmr.msra.gmra.mrb[8].mxu1 %vm1308_vm2, %v1353_v61 }
 0x67c   : > { %v3703_v63 = vpop.eup %3702  ;;  %3273 = vmatpush3.bf16.msra.mxu1 %v3586_v52 }
 0x67d   : > { %3274 = vmatprep.subr.bf16.mxu1 %v3587_v62  ;;  %v1351_v5 = vmul.f32 %v3703_v63, %v3695_v48 }
 0x67e   : > { %v3705_v2 = vpop.eup %3704 }
 0x67f   : > { %v1352_v6 = vmul.f32 %v3705_v2, %v3697_v50  ;;  %v3611_v2 = vld [vmem:[#allocation20 + $0x4c] ss:$16 sps:$4 sm:$0xff]  }
 0x680   : > { %3275 = vmatpush3.bf16.msra.mxu1 %v3587_v62 }
 0x681   : > { %v1354_v7 = vpack.c.bf16 %v1352_v6, %v1351_v5  ;;  %3276 = vmatprep.subr.bf16.mxu1 %v3588_v1  ;;  %v3606_v5 = vld [vmem:[#allocation20 + $0x40] ss:$16 sps:$4 sm:$0xff]   ;;  %v3609_v6 = vld [vmem:[#allocation20 + $0x48] ss:$16 sps:$4 sm:$0xff]  }
 0x683   : > { %3269 = vmatmul.mubr.msk.bf16.vlgmr.msra.gmra.mrb[12].mxu0 %vm1308_vm2, %v1354_v7  ;;  %v3614_v7 = vld [vmem:[#allocation20 + $0x64] ss:$16 sps:$4 sm:$0xff]  }
 0x684   : > { %3277 = vmatpush3.bf16.msra.mxu1 %v3588_v1  ;;  %1889 = vmatprep.mubr.bf16.mxu0 %v4424_v45  ;;  %v3608_v1 = vld [vmem:[#allocation20 + $0x44] ss:$16 sps:$4 sm:$0xff]  }
 0x685   : > { %3278 = vmatprep.subr.bf16.mxu1 %v3589_v10 }
 0x688   : > { %3279 = vmatpush3.bf16.msra.mxu1 %v3589_v10  ;;  %v3617_v10 = vld [vmem:[#allocation20 + $0x6c] ss:$16 sps:$4 sm:$0xff]  }
 0x689   : > { %3280 = vmatprep.subr.bf16.mxu1 %v3590_v11 }
 0x68c   : > { %3281 = vmatpush3.bf16.msra.mxu1 %v3590_v11  ;;  %v3612_v11 = vld [vmem:[#allocation20 + $0x60] ss:$16 sps:$4 sm:$0xff]  }
 0x68d   : > { %3282 = vmatprep.subr.bf16.mxu1 %v3591_v12 }
 0x690   : > { %3283 = vmatpush3.bf16.msra.mxu1 %v3591_v12  ;;  %v3615_v12 = vld [vmem:[#allocation20 + $0x68] ss:$16 sps:$4 sm:$0xff]  }
 0x691   : > { %3284 = vmatprep.subr.bf16.mxu1 %v3592_v13 }
 0x694   : > { %3285 = vmatpush3.bf16.msra.mxu1 %v3592_v13  ;;  %v3620_v13 = vld [vmem:[#allocation20 + $0x84] ss:$16 sps:$4 sm:$0xff]  }
 0x695   : > { %3286 = vmatprep.subr.bf16.mxu1 %v3593_v14 }
 0x698   : > { %3287 = vmatpush3.bf16.msra.mxu1 %v3593_v14  ;;  %v3623_v14 = vld [vmem:[#allocation20 + $0x8c] ss:$16 sps:$4 sm:$0xff]  }
 0x74e   : > { %v1394_v15 = vpop.f32.mrb[8].mxu1 }
 0x74f   : > { %v3264_v16 = vpop.f32.mrb[9].mxu1 }
 0x750   : > { %v1397_v17 = vpop.f32.mrb[10].mxu1  ;;  %v3621_v16 = vld [vmem:[#allocation20 + $0x88] ss:$16 sps:$4 sm:$0xff]  }
 0x751   : > { %v1445_v20 = vpack.c.bf16 %v1397_v17, %v1394_v15  ;;  %v3265_v21 = vpop.f32.mrb[11].mxu1  ;;  %v3618_v15 = vld [vmem:[#allocation20 + $0x80] ss:$16 sps:$4 sm:$0xff]   ;;  %v3626_v17 = vld [vmem:[#allocation20 + $0xa4] ss:$16 sps:$4 sm:$0xff]  }
 0x752   : > { %v3624_v21 = vld [vmem:[#allocation20 + $0xa0] ss:$16 sps:$4 sm:$0xff]  }
 0x753   : > { %3288 = vmatprep.mubr.bf16.mxu1 %v1445_v20  ;;  %v3629_v20 = vld [vmem:[#allocation20 + $0xac] ss:$16 sps:$4 sm:$0xff]  }
 0x756   : > { %v1438_v18 = vpop.f32.mrb[12].mxu0 }
 0x757   : > { %v3270_v22 = vpop.f32.mrb[13].mxu0 }
 0x758   : > { %v1441_v23 = vpop.f32.mrb[14].mxu0  ;;  %v3632_v22 = vld [vmem:[#allocation20 + $0xc4] ss:$16 sps:$4 sm:$0xff]  }
 0x759   : > { %v1446_v19 = vpack.c.bf16 %v1441_v23, %v1438_v18  ;;  %v3271_v27 = vpop.f32.mrb[15].mxu0  ;;  %v3627_v18 = vld [vmem:[#allocation20 + $0xa8] ss:$16 sps:$4 sm:$0xff]   ;;  %v3635_v23 = vld [vmem:[#allocation20 + $0xcc] ss:$16 sps:$4 sm:$0xff]  }
 0x75a   : > { %v3633_v27 = vld [vmem:[#allocation20 + $0xc8] ss:$16 sps:$4 sm:$0xff]  }
 0x75b   : > { %3289 = vmatmul.mubr.bf16.vlgmr.msra.gmra.mrb[12].mxu1 %v1446_v19  ;;  %v3630_v19 = vld [vmem:[#allocation20 + $0xc0] ss:$16 sps:$4 sm:$0xff]  }
 0x75c   : > { %1942 = vmatprep.mubr.bf16.mxu1 %v4424_v45 }
 0x82e   : > { %v3290_v29 = vpop.f32.mrb[12].mxu1 }
 0x82f   : > { %v1545_v32 = vpop.f32.mrb[13].mxu1  ;;  %v1562_v36 = vadd.f32 %v3290_v29, %v5113_v4  ;;  %v3596_v4 = vld [vmem:[#allocation20 + $0x4] ss:$16 sps:$4 sm:$0xff]  }
 0x830   : > { %v1560_v33 = vadd.f32 %v1545_v32, %v5111_v3  ;;  %v3291_v34 = vpop.f32.mrb[14].mxu1  ;;  %v3594_v3 = vld [vmem:[#allocation20] ss:$16 sps:$4 sm:$0xff]   ;;  %1857 = vmatprep.subr.bf16.mxu0 %v3596_v4  ;;  %v3638_v29 = vld [vmem:[#allocation20 + $0xe4] ss:$16 sps:$4 sm:$0xff]  }
 0x831   : > { %v1548_v35 = vpop.f32.mrb[15].mxu1  ;;  %v1563_v39 = vadd.f32 %v3291_v34, %v5121_v9  ;;  %v5212_v41 = vadd.f32 %v3029_v31, %v1562_v36  ;;  %v3605_v9 = vld [vmem:[#allocation20 + $0x2c] ss:$16 sps:$4 sm:$0xff]   ;;  %1858 = vmatpush1.bf16.msra.mxu0 %v3594_v3  ;;  %v3636_v32 = vld [vmem:[#allocation20 + $0xe0] ss:$16 sps:$4 sm:$0xff]  }
 0x832   : > { %v5205_v37 = vadd.f32 %v3029_v31, %v1560_v33  ;;  %v1561_v38 = vadd.f32 %v1548_v35, %v5119_v8  ;;  %v3599_v8 = vld [vmem:[#allocation20 + $0xc] ss:$16 sps:$4 sm:$0xff]   ;;  %1859 = vmatprep.subr.bf16.mxu0 %v3602_v44  ;;  %v3639_v33 = vld [vmem:[#allocation20 + $0xe8] ss:$16 sps:$4 sm:$0xff]  }
 0x833   : > { %v5215_v42 = vadd.f32 %v3029_v31, %v1563_v39  ;;  %1910 = vmatprep.subr.bf16.mxu1 %v3599_v8 }
 0x834   : > { %v5209_v40 = vadd.f32 %v3029_v31, %v1561_v38  ;;  %1577 = vadd.xlane.f32.xlu0 %v5205_v37  ;;  %1911 = vmatpush1.bf16.msra.mxu1 %v3597_v43  ;;  %v3641_v31 = vld [vmem:[#allocation20 + $0xec] ss:$16 sps:$4 sm:$0xff]  }
 0x835   : > { %1912 = vmatprep.subr.bf16.mxu1 %v3605_v9  ;;  %1860 = vmatpush1.bf16.msra.mxu0 %v3600_v46 }
 0x836   : > { %1579 = vadd.xlane.f32.xlu1 %v5209_v40  ;;  %1861 = vmatprep.subr.bf16.mxu0 %v3608_v1 }
 0x838   : > { %1581 = vadd.xlane.f32.xlu0 %v5212_v41  ;;  %1913 = vmatpush1.bf16.msra.mxu1 %v3603_v47 }
 0x839   : > { %1914 = vmatprep.subr.bf16.mxu1 %v3611_v2  ;;  %1862 = vmatpush1.bf16.msra.mxu0 %v3606_v5 }
 0x83a   : > { %1583 = vadd.xlane.f32.xlu1 %v5215_v42  ;;  %1863 = vmatprep.subr.bf16.mxu0 %v3614_v7 }
 0x83c   : > { %1915 = vmatpush1.bf16.msra.mxu1 %v3609_v6 }
 0x83d   : > { %1916 = vmatprep.subr.bf16.mxu1 %v3617_v10  ;;  %1864 = vmatpush1.bf16.msra.mxu0 %v3612_v11  ;;  %v3642_v10 = vld [vmem:[#allocation23 + $0x40] sm:$0xff]  }
 0x83e   : > { %1865 = vmatprep.subr.bf16.mxu0 %v3620_v13  ;;  %v3643_v11 = vld [vmem:[#allocation23 + $0xc0] sm:$0xff]   ;;  %v3647_v13 = vld [vmem:[#allocation23 + $0xc8] sm:$0xff]  }
 0x840   : > { %1917 = vmatpush1.bf16.msra.mxu1 %v3615_v12  ;;  %v3644_v12 = vld [vmem:[#allocation23] sm:$0xff]  }
 0x841   : > { %1918 = vmatprep.subr.bf16.mxu1 %v3623_v14  ;;  %1866 = vmatpush1.bf16.msra.mxu0 %v3618_v15  ;;  %v3648_v14 = vld [vmem:[#allocation23 + $0x8] sm:$0xff]  }
 0x842   : > { %1867 = vmatprep.subr.bf16.mxu0 %v3626_v17  ;;  %v3649_v15 = vld [vmem:[#allocation23 + $0x88] sm:$0xff]   ;;  %v3652_v17 = vld [vmem:[#allocation23 + $0x10] sm:$0xff]  }
 0x844   : > { %1919 = vmatpush1.bf16.msra.mxu1 %v3621_v16  ;;  %v3651_v16 = vld [vmem:[#allocation23 + $0xd0] sm:$0xff]  }
 0x845   : > { %1920 = vmatprep.subr.bf16.mxu1 %v3629_v20  ;;  %1868 = vmatpush1.bf16.msra.mxu0 %v3624_v21  ;;  %v3653_v20 = vld [vmem:[#allocation23 + $0x90] sm:$0xff]   ;;  %v3654_v21 = vld [vmem:[#allocation23 + $0x58] sm:$0xff]  }
 0x846   : > { %1869 = vmatprep.subr.bf16.mxu0 %v3632_v22  ;;  %v3656_v22 = vld [vmem:[#allocation23 + $0x18] sm:$0xff]  }
 0x848   : > { %1921 = vmatpush1.bf16.msra.mxu1 %v3627_v18  ;;  %v3655_v18 = vld [vmem:[#allocation23 + $0xd8] sm:$0xff]  }
 0x849   : > { %1922 = vmatprep.subr.bf16.mxu1 %v3635_v23  ;;  %1870 = vmatpush1.bf16.msra.mxu0 %v3630_v19  ;;  %v3657_v23 = vld [vmem:[#allocation23 + $0x98] sm:$0xff]   ;;  %v3658_v19 = vld [vmem:[#allocation23 + $0x60] sm:$0xff]  }
 0x84a   : > { %1871 = vmatprep.subr.bf16.mxu0 %v3638_v29  ;;  %v3660_v29 = vld [vmem:[#allocation23 + $0x20] sm:$0xff]  }
 0x84c   : > { %1923 = vmatpush1.bf16.msra.mxu1 %v3633_v27  ;;  %v3659_v27 = vld [vmem:[#allocation23 + $0xe0] sm:$0xff]  }
 0x84d   : > { %1924 = vmatprep.subr.bf16.mxu1 %v3641_v31  ;;  %1872 = vmatpush1.bf16.msra.mxu0 %v3636_v32  ;;  %v3661_v31 = vld [vmem:[#allocation23 + $0xa0] sm:$0xff]   ;;  %v3662_v32 = vld [vmem:[#allocation23 + $0x68] sm:$0xff]  }
 0x84e   : > { %3158 = vmatprep.subr.bf16.mxu0 %v3642_v10 }
 0x850   : > { %1925 = vmatpush1.bf16.msra.mxu1 %v3639_v33  ;;  %v3663_v33 = vld [vmem:[#allocation23 + $0xe8] sm:$0xff]  }
 0x851   : > { %3186 = vmatprep.subr.bf16.mxu1 %v3643_v11 }
 0x8c1   : > { %v1578_v48 = vpop.xlane.xlu0 %1577 }
 0x8c2   : > { %v1585_v49 = vmul.f32 0.0078125, %v1578_v48  ;;  %v3030_v48 = vld [vmem:[#allocation17] ss:$0 sm:$0xff] }
 0x8c3   : > { %v1580_v50 = vpop.xlane.xlu1 %1579 }
 0x8c4   : > { %v5220_v51 = vsub.f32 %v5205_v37, %v1585_v49  ;;  %v1586_v52 = vmul.f32 0.0078125, %v1580_v50 }
 0x8c5   : > { %v1582_v53 = vpop.xlane.xlu0 %1581 }
 0x8c6   : > { %v5223_v54 = vsub.f32 %v5209_v40, %v1586_v52  ;;  %v1587_v55 = vmul.f32 0.0078125, %v1582_v53  ;;  %v1593_v56 = vmul.f32 %v5220_v51, %v5220_v51 }
 0x8c7   : > { %v1584_v57 = vpop.xlane.xlu1 %1583 }
 0x8c8   : > { %v5228_v58 = vsub.f32 %v5212_v41, %v1587_v55  ;;  %v1588_v59 = vmul.f32 0.0078125, %v1584_v57  ;;  %1597 = vadd.xlane.f32.xlu0 %v1593_v56  ;;  %v1594_v60 = vmul.f32 %v5223_v54, %v5223_v54  ;;  %v3031_v56 = vld [vmem:[#allocation19] ss:$0 sm:$0xff] }
 0x8ca   : > { %v5233_v61 = vsub.f32 %v5215_v42, %v1588_v59  ;;  %1599 = vadd.xlane.f32.xlu1 %v1594_v60  ;;  %v1595_v62 = vmul.f32 %v5228_v58, %v5228_v58 }
 0x8cc   : > { %1601 = vadd.xlane.f32.xlu0 %v1595_v62  ;;  %v1596_v63 = vmul.f32 %v5233_v61, %v5233_v61 }
 0x8ce   : > { %1603 = vadd.xlane.f32.xlu1 %v1596_v63 }
 0x955   : > { %v1598_v34 = vpop.xlane.xlu0 %1597 }
 0x956   : > { %v1605_v35 = vmul.f32 0.0078125, %v1598_v34  ;;  %v3664_v34 = vld [vmem:[#allocation23 + $0x28] sm:$0xff]  }
 0x957   : > { %v1600_v36 = vpop.xlane.xlu1 %1599 }
 0x958   : > { %v1609_v38 = vadd.f32 1e-05, %v1605_v35  ;;  %v1606_v39 = vmul.f32 0.0078125, %v1600_v36  ;;  %v3665_v35 = vld [vmem:[#allocation23 + $0xa8] sm:$0xff]   ;;  %v3666_v36 = vld [vmem:[#allocation23 + $0x70] sm:$0xff]  }
 0x959   : > { %v1602_v3 = vpop.xlane.xlu0 %1601 }
 0x95a   : > { %3706 = vrsqrt.f32 %v1609_v38  ;;  %v1610_v4 = vadd.f32 1e-05, %v1606_v39  ;;  %v1607_v43 = vmul.f32 0.0078125, %v1602_v3  ;;  %v3667_v38 = vld [vmem:[#allocation23 + $0xf0] sm:$0xff]  }
 0x95b   : > { %v1604_v8 = vpop.xlane.xlu1 %1603  ;;  %v3668_v39 = vld [vmem:[#allocation23 + $0x30] sm:$0xff]  }
 0x95c   : > { %3708 = vrsqrt.f32 %v1610_v4  ;;  %v1611_v44 = vadd.f32 1e-05, %v1607_v43  ;;  %v1608_v9 = vmul.f32 0.0078125, %v1604_v8  ;;  %v3669_v3 = vld [vmem:[#allocation23 + $0xb0] sm:$0xff]   ;;  %v3670_v4 = vld [vmem:[#allocation23 + $0x78] sm:$0xff]  }
 0x95d   : > { %v3671_v43 = vld [vmem:[#allocation23 + $0xf8] sm:$0xff]  }
 0x95e   : > { %3710 = vrsqrt.f32 %v1611_v44  ;;  %v1612_v46 = vadd.f32 1e-05, %v1608_v9  ;;  %v3672_v8 = vld [vmem:[#allocation23 + $0x38] sm:$0xff]  }
 0x95f   : > { %v3673_v44 = vld [vmem:[#allocation23 + $0xb8] sm:$0xff]  }
 0x960   : > { %3712 = vrsqrt.f32 %v1612_v46  ;;  %v2468_v9 = vld [vmem:[%s5067_s2] sm:$0x3] }
 0x961   : > { %2471 = vperm.xlu0 %3553, %v2468_v9   ;;  %v1675_v46 = vld [vmem:[#allocation22] sm:$0xf] }
 0x964   : > { %v3707_v47 = vpop.eup %3706 }
 0x965   : > { %v1617_v49 = vmul.f32 %v3707_v47, %v5220_v51  ;;  %v1691_v47 = vsub.s32 3, %v5158_v25 }
 0x966   : > { %v3709_v50 = vpop.eup %3708 }
 0x967   : > { %v1618_v52 = vmul.f32 %v3709_v50, %v5223_v54  ;;  %v1627_v53 = vmul.f32 %v3030_v48, %v1617_v49  ;;  %v5252_v49 = vrot.slane %v1675_v46, %v968_v30  ;;  %v5256_v50 = vrot.slane %v1675_v46, %v964_v28 }
 0x968   : > { %v3711_v55 = vpop.eup %3710 }
 0x969   : > { %v1628_v57 = vmul.f32 %v3030_v48, %v1618_v52  ;;  %v1637_v60 = vadd.f32 %v3031_v56, %v1627_v53  ;;  %v1619_v63 = vmul.f32 %v3711_v55, %v5228_v58  ;;  %v3645_v58 = vld [vmem:[#allocation23 + $0x80] sm:$0xff]   ;;  %v5258_v52 = vrot.slane %v1675_v46, %v1691_v47 }
 0x96a   : > { %v3713_v59 = vpop.eup %3712 }
 0x96b   : > { %v1638_v62 = vadd.f32 %v3031_v56, %v1628_v57  ;;  %v1620_v1 = vmul.f32 %v3713_v59, %v5233_v61  ;;  %v1629_v6 = vmul.f32 %v3030_v48, %v1619_v63  ;;  %v3646_v61 = vld [vmem:[#allocation23 + $0x48] sm:$0xff]  }
 0x96d   : > { %v1641_v2 = vpack.c.bf16 %v1638_v62, %v1637_v60  ;;  %v1630_v5 = vmul.f32 %v3030_v48, %v1620_v1  ;;  %v1639_v54 = vadd.f32 %v3031_v56, %v1629_v6  ;;  %v1680_v48 = vrot.slane %v1675_v46, %v960_v26 }
 0x96f   : > { %1890 = vmatmul.mubr.bf16.vlgmr.msra.gmra.mrb[16].mxu0 %v1641_v2  ;;  %1943 = vmatmul.mubr.bf16.vlgmr.msra.gmra.mrb[16].mxu1 %v1641_v2  ;;  %v1640_v51 = vadd.f32 %v3031_v56, %v1630_v5 }
 0x970   : > { %1899 = vmatprep.mubr.bf16.mxu0 %v4424_v45  ;;  %1952 = vmatprep.mubr.bf16.mxu1 %v4424_v45  ;;  %v3650_v45 = vld [vmem:[#allocation23 + $0x50] sm:$0xff]  }
 0x971   : > { %v1642_v7 = vpack.c.bf16 %v1640_v51, %v1639_v54  ;;  %3159 = vmatpush3.bf16.msra.mxu0 %v3644_v12  ;;  %3187 = vmatpush3.bf16.msra.mxu1 %v3645_v58 }
 0x972   : > { %3160 = vmatprep.subr.bf16.mxu0 %v3646_v61  ;;  %3188 = vmatprep.subr.bf16.mxu1 %v3647_v13 }
 0x975   : > { %3161 = vmatpush3.bf16.msra.mxu0 %v3648_v14  ;;  %3189 = vmatpush3.bf16.msra.mxu1 %v3649_v15 }
 0x976   : > { %3162 = vmatprep.subr.bf16.mxu0 %v3650_v45  ;;  %3190 = vmatprep.subr.bf16.mxu1 %v3651_v16 }
 0x977   : > { %1900 = vmatmul.mubr.bf16.gmra.mrb[20].mxu0 %v1642_v7  ;;  %1953 = vmatmul.mubr.bf16.gmra.mrb[20].mxu1 %v1642_v7 }
 0x979   : > { %3163 = vmatpush3.bf16.msra.mxu0 %v3652_v17  ;;  %3191 = vmatpush3.bf16.msra.mxu1 %v3653_v20 }
 0x97a   : > { %3164 = vmatprep.subr.bf16.mxu0 %v3654_v21  ;;  %3192 = vmatprep.subr.bf16.mxu1 %v3655_v18 }
 0x97d   : > { %3165 = vmatpush3.bf16.msra.mxu0 %v3656_v22  ;;  %3193 = vmatpush3.bf16.msra.mxu1 %v3657_v23 }
 0x97e   : > { %3166 = vmatprep.subr.bf16.mxu0 %v3658_v19  ;;  %3194 = vmatprep.subr.bf16.mxu1 %v3659_v27 }
 0x981   : > { %3167 = vmatpush3.bf16.msra.mxu0 %v3660_v29  ;;  %3195 = vmatpush3.bf16.msra.mxu1 %v3661_v31 }
 0x982   : > { %3168 = vmatprep.subr.bf16.mxu0 %v3662_v32  ;;  %3196 = vmatprep.subr.bf16.mxu1 %v3663_v33 }
 0x985   : > { %3169 = vmatpush3.bf16.msra.mxu0 %v3664_v34  ;;  %3197 = vmatpush3.bf16.msra.mxu1 %v3665_v35 }
 0x986   : > { %3170 = vmatprep.subr.bf16.mxu0 %v3666_v36  ;;  %3198 = vmatprep.subr.bf16.mxu1 %v3667_v38 }
 0x989   : > { %3171 = vmatpush3.bf16.msra.mxu0 %v3668_v39  ;;  %3199 = vmatpush3.bf16.msra.mxu1 %v3669_v3 }
 0x98a   : > { %3172 = vmatprep.subr.bf16.mxu0 %v3670_v4  ;;  %3200 = vmatprep.subr.bf16.mxu1 %v3671_v43 }
 0x98d   : > { %3173 = vmatpush3.bf16.msra.mxu0 %v3672_v8  ;;  %3201 = vmatpush3.bf16.msra.mxu1 %v3673_v44 }
 0x98e   : > { %3303 = vmatprep.subr.bf16.mxu0 %v4425_v24 }
 0xa42   : > { %v1891_v53 = vpop.f32.mrb[16].mxu0  ;;  %v1944_v55 = vpop.f32.mrb[16].mxu1 }
 0xa43   : > { %v5260_v56 = vadd.f32 %v1891_v53, %v1680_v48  ;;  %v5263_v57 = vadd.f32 %v1944_v55, %v5252_v49  ;;  %v1893_v59 = vpop.f32.mrb[17].mxu0  ;;  %v1946_v60 = vpop.f32.mrb[17].mxu1 }
 0xa44   : > { %v5266_v26 = vadd.f32 %v1893_v59, %v5256_v50  ;;  %v5269_v30 = vadd.f32 %v1946_v60, %v5258_v52  ;;  %v1895_v62 = vpop.f32.mrb[18].mxu0  ;;  %v1948_v28 = vpop.f32.mrb[18].mxu1 }
 0xa45   : > { %v3064_v63 = vmul.f32 -1.702, %v5260_v56  ;;  %v3066_v1 = vmul.f32 -1.702, %v5263_v57  ;;  %v5273_v2 = vadd.f32 %v1895_v62, %v1680_v48  ;;  %v5276_v5 = vadd.f32 %v1948_v28, %v5252_v49  ;;  %v1897_v6 = vpop.f32.mrb[19].mxu0  ;;  %v1950_v51 = vpop.f32.mrb[19].mxu1 }
 0xa46   : > { %v3065_v54 = vmul.f32 -1.702, %v5266_v26  ;;  %v3067_v7 = vmul.f32 -1.702, %v5269_v30  ;;  %v5281_v10 = vadd.f32 %v1897_v6, %v5256_v50  ;;  %v5284_v11 = vadd.f32 %v1950_v51, %v5258_v52 }
 0xa47   : > { %v1995_v12 = vmul.f32 1.442695, %v3064_v63  ;;  %v1999_v58 = vmul.f32 1.442695, %v3066_v1  ;;  %v3068_v61 = vmul.f32 -1.702, %v5273_v2 }
 0xa48   : > { %v1997_v13 = vmul.f32 1.442695, %v3065_v54  ;;  %v2001_v14 = vmul.f32 1.442695, %v3067_v7  ;;  %v3070_v15 = vmul.f32 -1.702, %v5276_v5 }
 0xa49   : > { %3714 = vpow2.f32 %v1995_v12  ;;  %v2003_v45 = vmul.f32 1.442695, %v3068_v61  ;;  %v3069_v16 = vmul.f32 -1.702, %v5281_v10  ;;  %v3071_v17 = vmul.f32 -1.702, %v5284_v11 }
 0xa4a   : > { %3716 = vpow2.f32 %v1999_v58  ;;  %v2007_v20 = vmul.f32 1.442695, %v3070_v15  ;;  %v1901_v21 = vpop.f32.mrb[20].mxu0  ;;  %v1954_v18 = vpop.f32.mrb[20].mxu1 }
 0xa4b   : > { %3718 = vpow2.f32 %v1997_v13  ;;  %v2005_v22 = vmul.f32 1.442695, %v3069_v16  ;;  %v5290_v23 = vadd.f32 %v1901_v21, %v1680_v48  ;;  %v1903_v19 = vpop.f32.mrb[21].mxu0  ;;  %v1956_v27 = vpop.f32.mrb[21].mxu1  ;;  %v2009_v29 = vmul.f32 1.442695, %v3071_v17 }
 0xa4c   : > { %3720 = vpow2.f32 %v2001_v14  ;;  %v5293_v31 = vadd.f32 %v1954_v18, %v5252_v49  ;;  %v5296_v32 = vadd.f32 %v1903_v19, %v5256_v50  ;;  %v1905_v33 = vpop.f32.mrb[22].mxu0  ;;  %v1958_v34 = vpop.f32.mrb[22].mxu1  ;;  %v5305_v47 = vadd.f32 %v1956_v27, %v5258_v52 }
 0xa4d   : > { %3722 = vpow2.f32 %v2003_v45  ;;  %v3072_v35 = vmul.f32 -1.702, %v5290_v23  ;;  %v5299_v36 = vadd.f32 %v1905_v33, %v1680_v48  ;;  %v1907_v38 = vpop.f32.mrb[23].mxu0  ;;  %v1960_v39 = vpop.f32.mrb[23].mxu1  ;;  %v5309_v51 = vadd.f32 %v1958_v34, %v5252_v49 }
 0xa4e   : > { %3724 = vpow2.f32 %v2007_v20  ;;  %v3074_v3 = vmul.f32 -1.702, %v5293_v31  ;;  %v3073_v4 = vmul.f32 -1.702, %v5296_v32  ;;  %v3075_v63 = vmul.f32 -1.702, %v5305_v47 }
 0xa4f   : > { %3726 = vpow2.f32 %v2005_v22  ;;  %v2011_v43 = vmul.f32 1.442695, %v3072_v35  ;;  %v3076_v8 = vmul.f32 -1.702, %v5299_v36  ;;  %v5312_v12 = vadd.f32 %v1907_v38, %v5256_v50 }
 0xa50   : > { %3728 = vpow2.f32 %v2009_v29  ;;  %v2015_v44 = vmul.f32 1.442695, %v3074_v3  ;;  %v2013_v9 = vmul.f32 1.442695, %v3073_v4  ;;  %v5315_v13 = vadd.f32 %v1960_v39, %v5258_v52 }
 0xa51   : > { %3730 = vpow2.f32 %v2011_v43  ;;  %v2019_v46 = vmul.f32 1.442695, %v3076_v8  ;;  %v2017_v45 = vmul.f32 1.442695, %v3075_v63  ;;  %v3078_v17 = vmul.f32 -1.702, %v5309_v51 }
 0xa52   : > { %3732 = vpow2.f32 %v2015_v44  ;;  %v3077_v50 = vmul.f32 -1.702, %v5312_v12  ;;  %v3079_v18 = vmul.f32 -1.702, %v5315_v13 }
 0xa53   : > { %v3715_v48 = vpop.eup %3714  ;;  %3734 = vpow2.f32 %v2013_v9  ;;  %v2023_v19 = vmul.f32 1.442695, %v3078_v17 }
 0xa54   : > { %v3717_v53 = vpop.eup %3716  ;;  %v2027_v55 = vadd.f32 1.0, %v3715_v48  ;;  %3736 = vpow2.f32 %v2019_v46  ;;  %v2021_v33 = vmul.f32 1.442695, %v3077_v50  ;;  %v2025_v35 = vmul.f32 1.442695, %v3079_v18 }
 0xa55   : > { %v3719_v59 = vpop.eup %3718  ;;  %v2029_v60 = vadd.f32 1.0, %v3717_v53 }
 0xa56   : > { %v3721_v62 = vpop.eup %3720  ;;  %3738 = vrcp.f32 %v2027_v55  ;;  %v2028_v28 = vadd.f32 1.0, %v3719_v59 }
 0xa57   : > { %v3723_v1 = vpop.eup %3722  ;;  %3740 = vrcp.f32 %v2029_v60  ;;  %v2030_v6 = vadd.f32 1.0, %v3721_v62 }
 0xa58   : > { %v3725_v54 = vpop.eup %3724  ;;  %3742 = vrcp.f32 %v2028_v28  ;;  %v2031_v7 = vadd.f32 1.0, %v3723_v1 }
 0xa59   : > { %v3727_v58 = vpop.eup %3726  ;;  %3744 = vrcp.f32 %v2030_v6  ;;  %v2033_v61 = vadd.f32 1.0, %v3725_v54 }
 0xa5a   : > { %v3729_v14 = vpop.eup %3728  ;;  %3746 = vrcp.f32 %v2031_v7  ;;  %v2032_v15 = vadd.f32 1.0, %v3727_v58 }
 0xa5b   : > { %v3731_v16 = vpop.eup %3730  ;;  %3748 = vrcp.f32 %v2033_v61  ;;  %v2034_v49 = vadd.f32 1.0, %v3729_v14 }
 0xa5c   : > { %3750 = vrcp.f32 %v2032_v15  ;;  %v2035_v20 = vadd.f32 1.0, %v3731_v16  ;;  %v3733_v21 = vpop.eup %3732 }
 0xa5d   : > { %3752 = vrcp.f32 %v2034_v49  ;;  %v3735_v22 = vpop.eup %3734  ;;  %v2037_v63 = vadd.f32 1.0, %v3733_v21 }
 0xa5e   : > { %3754 = vpow2.f32 %v2017_v45  ;;  %v3737_v52 = vpop.eup %3736  ;;  %v2036_v6 = vadd.f32 1.0, %v3735_v22 }
 0xa5f   : > { %3756 = vrcp.f32 %v2035_v20  ;;  %v2039_v29 = vadd.f32 1.0, %v3737_v52 }
 0xa60   : > { %v3739_v27 = vpop.eup %3738 }
 0xa61   : > { %v3741_v34 = vpop.eup %3740  ;;  %3758 = vrcp.f32 %v2039_v29  ;;  %v2075_v43 = vmul.f32 %v3739_v27, %v5260_v56 }
 0xa62   : > { %v3743_v38 = vpop.eup %3742  ;;  %3760 = vpow2.f32 %v2023_v19  ;;  %v2077_v9 = vmul.f32 %v3741_v34, %v5263_v57 }
 0xa63   : > { %v3745_v39 = vpop.eup %3744  ;;  %3762 = vpow2.f32 %v2021_v33  ;;  %v2076_v53 = vmul.f32 %v3743_v38, %v5266_v26 }
 0xa64   : > { %v3747_v3 = vpop.eup %3746  ;;  %3764 = vpow2.f32 %v2025_v35  ;;  %v2078_v62 = vmul.f32 %v3745_v39, %v5269_v30 }
 0xa65   : > { %v3749_v4 = vpop.eup %3748  ;;  %v2079_v8 = vmul.f32 %v3747_v3, %v5273_v2  ;;  %3766 = vrcp.f32 %v2037_v63 }
 0xa66   : > { %v3751_v44 = vpop.eup %3750  ;;  %v2081_v46 = vmul.f32 %v3749_v4, %v5276_v5  ;;  %3768 = vrcp.f32 %v2036_v6 }
 0xa67   : > { %v3753_v48 = vpop.eup %3752  ;;  %v2091_v55 = vpack.c.bf16 %v2079_v8, %v2075_v43  ;;  %v2080_v59 = vmul.f32 %v3751_v44, %v5281_v10 }
 0xa68   : > { %v3755_v60 = vpop.eup %3754  ;;  %v2093_v28 = vpack.c.bf16 %v2081_v46, %v2077_v9  ;;  %v2082_v56 = vmul.f32 %v3753_v48, %v5284_v11  ;;  %v3112_v9 = vld [vmem:[#allocation25] ss:$0 sm:$0xff] }
 0xa69   : > { %v2092_v2 = vpack.c.bf16 %v2080_v59, %v2076_v53  ;;  %v3757_v1 = vpop.eup %3756  ;;  %v2038_v57 = vadd.f32 1.0, %v3755_v60 }
 0xa6a   : > { %v2094_v54 = vpack.c.bf16 %v2082_v56, %v2078_v62  ;;  %v2083_v7 = vmul.f32 %v3757_v1, %v5290_v23 }
 0xa6b   : > { %2387 = vmatprep.mubr.bf16.mxu0 %v2092_v2  ;;  %v3759_v5 = vpop.eup %3758  ;;  %3770 = vrcp.f32 %v2038_v57  ;;  %v2469_v57 = vmul.u32 16, %v5158_v25 }
 0xa6c   : > { %2436 = vmatprep.mubr.bf16.mxu1 %v2094_v54  ;;  %2388 = vmatmul.mubr.bf16.vlgmr.msra.gmra.mrb[24].mxu0 %v2091_v55  ;;  %v3761_v26 = vpop.eup %3760  ;;  %v2087_v10 = vmul.f32 %v3759_v5, %v5299_v36 }
 0xa6d   : > { %2437 = vmatmul.mubr.bf16.vlgmr.msra.gmra.mrb[24].mxu1 %v2093_v28  ;;  %v3763_v30 = vpop.eup %3762  ;;  %v2041_v11 = vadd.f32 1.0, %v3761_v26  ;;  %v2472_v26 = vpop.permute.xlu0 %2471 }
 0xa6e   : > { %v3765_v58 = vpop.eup %3764  ;;  %v2040_v61 = vadd.f32 1.0, %v3763_v30  ;;  %v2095_v14 = vpack.c.bf16 %v2087_v10, %v2083_v7  ;;  %v2473_v30 = vadd.s32 %v2472_v26, %v2469_v57 }
 0xa6f   : > { %3772 = vrcp.f32 %v2041_v11  ;;  %v2042_v15 = vadd.f32 1.0, %v3765_v58  ;;  %v3767_v45 = vpop.eup %3766 }
 0xa70   : > { %3774 = vrcp.f32 %v2040_v61  ;;  %v3769_v16 = vpop.eup %3768  ;;  %v2085_v20 = vmul.f32 %v3767_v45, %v5293_v31  ;;  %v4427_v31 = vmov 0.0|0.0   ;;  %vm2474_vm4 = vcmp.eq.s32.totalorder %v5175_v0, %v2473_v30 }
 0xa71   : > { %3776 = vrcp.f32 %v2042_v15  ;;  %v2084_v21 = vmul.f32 %v3769_v16, %v5296_v32  ;;  %3323 = vmatprep.subr.bf16.mxu1 %v4427_v31  ;;  %v3113_v15 = vsel %vm2474_vm4, 1.0, %v4425_v24 }
 0xa75   : > { %v3771_v49 = vpop.eup %3770 }
 0xa76   : > { %v2086_v22 = vmul.f32 %v3771_v49, %v5305_v47  ;;  %v3675_v49 = vld [vmem:[#allocation29 + $0x8] sm:$0xff]  }
 0xa79   : > { %v3773_v17 = vpop.eup %3772 }
 0xa7a   : > { %v3775_v23 = vpop.eup %3774  ;;  %v2089_v36 = vmul.f32 %v3773_v17, %v5309_v51 }
 0xa7b   : > { %v3777_v50 = vpop.eup %3776  ;;  %v2088_v18 = vmul.f32 %v3775_v23, %v5312_v12 }
 0xa7c   : > { %v2090_v52 = vmul.f32 %v3777_v50, %v5315_v13  ;;  %v2097_v19 = vpack.c.bf16 %v2089_v36, %v2085_v20  ;;  %v3676_v36 = vld [vmem:[#allocation29 + $0x10] sm:$0xff]   ;;  %v3677_v50 = vld [vmem:[#allocation29 + $0x18] sm:$0xff]  }
 0xa7d   : > { %v2096_v27 = vpack.c.bf16 %v2088_v18, %v2084_v21  ;;  %v3678_v21 = vld [vmem:[#allocation29 + $0x20] sm:$0xff]   ;;  %v3679_v18 = vld [vmem:[#allocation29 + $0x28] sm:$0xff]  }
 0xa7e   : > { %v2098_v29 = vpack.c.bf16 %v2090_v52, %v2086_v22  ;;  %v3680_v22 = vld [vmem:[#allocation29 + $0x30] sm:$0xff]   ;;  %v3681_v52 = vld [vmem:[#allocation29 + $0x38] sm:$0xff]  }
 0xa7f   : > { %2395 = vmatprep.mubr.bf16.mxu0 %v2096_v27 }
 0xa80   : > { %2444 = vmatprep.mubr.bf16.mxu1 %v2098_v29  ;;  %2396 = vmatmul.mubr.bf16.gmra.mrb[28].mxu0 %v2095_v14 }
 0xa81   : > { %2445 = vmatmul.mubr.bf16.gmra.mrb[28].mxu1 %v2097_v19  ;;  %3319 = vmatprep.mubr.msk.bf16.mxu0 %vm4426_vm0, %v4425_v24 }
 0xa82   : > { %3300 = vmatprep.mubr.msk.f32.mxu1 %vm4426_vm0, %v4425_v24 }
 0xb3f   : > { %v3174_v32 = vpop.f32.mrb[24].mxu0 }
 0xb40   : > { %v3202_v51 = vpop.f32.mrb[24].mxu1  ;;  %v3175_v47 = vpop.f32.mrb[25].mxu0 }
 0xb41   : > { %v3176_v12 = vadd.f32 %v3175_v47, %v3174_v32  ;;  %v3203_v13 = vpop.f32.mrb[25].mxu1  ;;  %v3177_v33 = vpop.f32.mrb[26].mxu0  ;;  %v3115_v32 = vld [vmem:[#allocation26] ss:$0 sm:$0xff]  ;;  %v3116_v47 = vld [vmem:[#allocation28] ss:$0 sm:$0xff] }
 0xb42   : > { %v3204_v34 = vadd.f32 %v3203_v13, %v3202_v51  ;;  %v3205_v35 = vpop.f32.mrb[26].mxu1  ;;  %v3178_v38 = vpop.f32.mrb[27].mxu0 }
 0xb43   : > { %v3179_v39 = vadd.f32 %v3178_v38, %v3177_v33  ;;  %v3206_v3 = vpop.f32.mrb[27].mxu1 }
 0xb44   : > { %v2439_v4 = vadd.f32 %v3204_v34, %v3176_v12  ;;  %v3207_v43 = vadd.f32 %v3206_v3, %v3205_v35 }
 0xb46   : > { %v2453_v8 = vadd.f32 %v2439_v4, %v5205_v37  ;;  %v2442_v44 = vadd.f32 %v3207_v43, %v3179_v39 }
 0xb48   : > { %v2454_v46 = vadd.f32 %v2442_v44, %v5209_v40  ;;  %v2464_v48 = vadd.f32 %v3112_v9, %v2453_v8 }
 0xb4a   : > { %v2465_v53 = vadd.f32 %v3112_v9, %v2454_v46 }
 0xb4c   : > { %v3324_v55 = vpack.c.bf16 %v2465_v53, %v2464_v48 }
 0xb4e   : > { %3325 = vmatpush3.bf16.msra.mxu1 %v3324_v55 }
 0xb4f   : > { %3326 = vmatprep.subr.bf16.mxu1 %v4427_v31 }
 0xb53   : > { %v3180_v59 = vpop.f32.mrb[28].mxu0 }
 0xb54   : > { %v3208_v60 = vpop.f32.mrb[28].mxu1  ;;  %v3181_v62 = vpop.f32.mrb[29].mxu0 }
 0xb55   : > { %v3182_v28 = vadd.f32 %v3181_v62, %v3180_v59  ;;  %v3209_v56 = vpop.f32.mrb[29].mxu1  ;;  %v3183_v63 = vpop.f32.mrb[30].mxu0 }
 0xb56   : > { %v3210_v2 = vadd.f32 %v3209_v56, %v3208_v60  ;;  %v3211_v1 = vpop.f32.mrb[30].mxu1  ;;  %v3184_v6 = vpop.f32.mrb[31].mxu0 }
 0xb57   : > { %v3185_v54 = vadd.f32 %v3184_v6, %v3183_v63  ;;  %v3212_v37 = vpop.f32.mrb[31].mxu1 }
 0xb58   : > { %v2447_v5 = vadd.f32 %v3210_v2, %v3182_v28  ;;  %v3213_v40 = vadd.f32 %v3212_v37, %v3211_v1 }
 0xb5a   : > { %v2455_v7 = vadd.f32 %v2447_v5, %v5212_v41  ;;  %v2450_v10 = vadd.f32 %v3213_v40, %v3185_v54  ;;  %v3674_v41 = vld [vmem:[#allocation29] sm:$0xff]  }
 0xb5b   : > { %3304 = vmatpush3.bf16.msra.mxu0 %v3674_v41 }
 0xb5c   : > { %v2456_v11 = vadd.f32 %v2450_v10, %v5215_v42  ;;  %v2466_v58 = vadd.f32 %v3112_v9, %v2455_v7  ;;  %3305 = vmatprep.subr.bf16.mxu0 %v4425_v24 }
 0xb5e   : > { %v2467_v61 = vadd.f32 %v3112_v9, %v2456_v11 }
 0xb5f   : > { %3306 = vmatpush3.bf16.msra.mxu0 %v3675_v49 }
 0xb60   : > { %v3327_v14 = vpack.c.bf16 %v2467_v61, %v2466_v58  ;;  %3307 = vmatprep.subr.bf16.mxu0 %v4425_v24 }
 0xb62   : > { %3328 = vmatpush3.bf16.msra.mxu1 %v3327_v14 }
 0xb63   : > { %3308 = vmatpush3.bf16.msra.mxu0 %v3676_v36 }
 0xb64   : > { %3309 = vmatprep.subr.bf16.mxu0 %v4425_v24 }
 0xb65   : > { %3301 = vmatmul.mubr.msk.f32.vlgmr.msra.gmra.mrb[32].mxu1 %vm2477_vm5, %v3113_v15 }
 0xb67   : > { %3310 = vmatpush3.bf16.msra.mxu0 %v3677_v50 }
 0xb68   : > { %3311 = vmatprep.subr.bf16.mxu0 %v4425_v24 }
 0xb6b   : > { %3312 = vmatpush3.bf16.msra.mxu0 %v3678_v21 }
 0xb6c   : > { %3313 = vmatprep.subr.bf16.mxu0 %v4425_v24 }
 0xb6f   : > { %3314 = vmatpush3.bf16.msra.mxu0 %v3679_v18 }
 0xb70   : > { %3315 = vmatprep.subr.bf16.mxu0 %v4425_v24 }
 0xb73   : > { %3316 = vmatpush3.bf16.msra.mxu0 %v3680_v22 }
 0xb74   : > { %3317 = vmatprep.subr.bf16.mxu0 %v4425_v24 }
 0xb77   : > { %3318 = vmatpush3.bf16.msra.mxu0 %v3681_v52 }
 0xc38   : > { %v2547_v25 = vpop.f32.mrb[32].mxu1 }
 0xc39   : > { %v2554_v45 = vsel %vm2553_vm6, %v2547_v25, 0.0  ;;  %v3302_v16 = vpop.f32.mrb[33].mxu1 }
 0xc3a   : > { %2555 = vadd.xlane.f32.xlu1 %v2554_v45 }
 0xcc7   : > { %v2556_v0 = vpop.xlane.xlu1 %2555 }
 0xcc8   : > { %v2557_v42 = vmul.f32 0.0078125, %v2556_v0 }
 0xcca   : > { %v2558_v17 = vsub.f32 %v2547_v25, %v2557_v42 }
 0xccc   : > { %v2559_v23 = vmul.f32 %v2558_v17, %v2558_v17 }
 0xcce   : > { %v2560_v20 = vsel %vm2553_vm6, %v2559_v23, 0.0 }
 0xccf   : > { %2561 = vadd.xlane.f32.xlu1 %v2560_v20 }
 0xd5c   : > { %v2562_v19 = vpop.xlane.xlu1 %2561 }
 0xd5d   : > { %v2563_v27 = vmul.f32 0.0078125, %v2562_v19 }
 0xd5f   : > { %v2564_v29 = vadd.f32 1e-05, %v2563_v27 }
 0xd61   : > { %3778 = vrsqrt.f32 %v2564_v29 }
 0xd6b   : > { %v3779_v31 = vpop.eup %3778 }
 0xd6c   : > { %v2566_v51 = vmul.f32 %v3779_v31, %v2558_v17 }
 0xd6e   : > { %v2573_v12 = vmul.f32 %v3115_v32, %v2566_v51 }
 0xd70   : > { %v2580_v13 = vadd.f32 %v3116_v47, %v2573_v12 }
 0xd72   : > { %v2581_v33 = vpack.c.bf16 %v2580_v13, %v2580_v13 }
 0xd74   : > { %3320 = vmatmul.mubr.bf16.vlgmr.msra.gmra.mrb[32].mxu0 %v2581_v33 }
 0xe47   : > { %v2680_v34 = vpop.f32.mrb[32].mxu0 }
 0xe48   : > { %v2686_v35 = vmul.f32 %v2680_v34, %v2680_v34  ;;  %v3321_v38 = vpop.f32.mrb[33].mxu0 }
 0xe49   : > { %v2683_v39 = vpop.f32.mrb[34].mxu0 }
 0xe4a   : > { %v3322_v24 = vpop.f32.mrb[35].mxu0  ;;  %v2687_v3 = vsel %vm2553_vm6, %v2686_v35, 0.0 }
 0xe4b   : > { %2688 = vadd.xlane.f32.xlu1 %v2687_v3 }
 0xed8   : > { %v2689_v4 = vpop.xlane.xlu1 %2688 }
 0xed9   : > { %v2690_v43 = vadd.f32 1e-12, %v2689_v4 }
 0xedb   : > { %3780 = vrsqrt.f32 %v2690_v43 }
 0xee5   : > { %v3781_v8 = vpop.eup %3780 }
 0xee6   : > { %v2692_v44 = vmul.f32 %v3781_v8, %v2680_v34 }
 0xee8   : > { %v2693_v9 = vpack.c.bf16 %v2692_v44, %v2692_v44 }
 0xeea   : > { %2694 = vst [vmem:[%s842_s29] sm:$0x1] %v2693_v9 }
 0xeeb   : > { %4303 = shalt.err (!%p4300_p7)
}
 0xeec   : > { %s4304_s21 = scalar_lea.hbm %s5362_s8, 16  ;;  %s4308_s7 = scalar_lea.hbm %s5525_s6, 32 }
 0xeed   : > { %p4305_p3 = scmp.ne.s32.totalorder %s5362_s8, %s4304_s21  ;;  %p4309_p8 = scmp.lt.u32.totalorder %s5362_s8, %s5525_s6 }
 0xeee   : > { %p4310_p9 = scmp.lt.u32.totalorder %s4308_s7, %s4304_s21  ;;  %p4312_p1 = scmp.lt.u32.totalorder %s4304_s21, %s5362_s8 }
 0xeef   : > { %p4306_p6 = pnand %p4305_p3, %p5526_p13 }
 0xef0   : > { %p4311_p12 = por %p4310_p9, %p4309_p8 }
 0xef1   : > { %p4307_p11 = pneg %p4306_p6 }
 0xef2   : > { %p4313_p0 = por %p4312_p1, %p4311_p12 }
 0xef4   : > { %p4314_p2 = pnand %p4313_p0, %p4307_p11 }
 0xef6   : > { %4317 = shalt.err (!%p4314_p2)
}
 0xef7   : > { %3397 = dma.vmem_to_hbm [thread:$0]  (%p5526_p13), %s5364_s17, 16, %s5362_s8, %s2696_s23  }
 0xef8 PF: > { %s5527_s2 = sld [smem:[#allocation44_spill]]  ;;  %s5528_s28 = sld [smem:[#allocation47_spill]] }
 0xef9   : > { %p5529_p4 = scmp.ne.s32.totalorder %s5494_s18, 0 }
 0xefe   : > { %s2720_s29 = sand.u32 1, %s5527_s2   ;;  %p5530_p10 = scmp.ge.s32.totalorder %s5528_s28, 2 }
 0xeff   : > { %s2721_s22 = scalar_lea.sflag [#allocation4], %s2720_s29 }
 0xf00   : > { %p3456_p5 = pnand %p5530_p10, %p5529_p4 }
 0xf02   : > { %4379 = dma.done.wait (!%p3456_p5), %s2721_s22, 16  }
 0xf03   : > { %4381 = vsyncadd (!%p3456_p5), %s2721_s22, 4294967280  ;;  %s5531_s27 = sld [smem:[#allocation45_spill]]  ;;  %s5532_s28 = sld [smem:[#allocation46_spill]] }
 0xf04   : > { %p42_p7 = scmp.ge.s32.totalorder %s4939_s30, 4   ;;  %s5533_s29 = smov %s4950_s24 }
 0xf06   :  { %44 = sbr.rel (!%p42_p7) target bundleno = 29 (0x1d), region = 214 }
 0xf0d   :  { %2725 = vsyncpa [#allocation3], 1 }
 0xf0e   :  { %2727 = vsyncpa [#allocation3 + $0x1], 1 }
 0xf0f   :  { %2728 = vsyncpa [#allocation6], 1 }
 0xf10   :  { %2730 = vsyncpa [#allocation6 + $0x1], 1 }
 0xf11   :  { %2731 = vsyncpa [#allocation9], 1 }
 0xf12   :  { %2732 = vsyncpa [#allocation12], 1 }
 0xf13   :  { %2733 = vsyncpa [#allocation15], 1 }
 0xf14   :  { %2734 = vsyncpa [#allocation18], 1 }
 0xf15   :  { %2735 = vsyncpa [#allocation21], 1 }
 0xf16   :  { %2736 = vsyncpa [#allocation24], 1 }
 0xf17   :  { %2737 = vsyncpa [#allocation27], 1 }
 0xf18   :  { %2738 = vsyncpa [#allocation30], 1 }
 0xf19   :  { %2739 = vsyncpa [#allocation4], 1 }
 0xf1a   :  { %2741 = vsyncpa [#allocation4 + $0x1], 1 }

</bundles_post_ra>
